<compile_context>
chip_gen: v6e
topology: v6e:2x2x1
jax: 0.10.0
libtpu: 0.0.40
codegen_flags: <defaults>
</compile_context>

<pallas_src>
import functools

import jax
import jax.numpy as jnp
import numpy as np
from jax.experimental import pallas as pl
from jax.experimental.pallas import tpu as pltpu


# ----------------------------------------------------------------------------
# RoPE tables (host-side glue, plain JAX)
# ----------------------------------------------------------------------------
def rope_tables(n, d_head, base=10000.0):
    """Per-head (n, d_head) rotate-half tables (used by the pure-JAX reference)."""
    half = d_head // 2
    inv_freq = 1.0 / (base ** (jnp.arange(half, dtype=jnp.float32) * 2.0 / d_head))
    ang = jnp.arange(n, dtype=jnp.float32)[:, None] * inv_freq[None, :]    # (n, half)
    cos = jnp.concatenate([jnp.cos(ang), jnp.cos(ang)], axis=-1)           # (n, d_head)
    sin = jnp.concatenate([jnp.sin(ang), jnp.sin(ang)], axis=-1)           # (n, d_head)
    return cos, sin


def rope_tables_flat(n, d_head, n_heads, base=10000.0):
    """Lane-dense (n, n_heads*d_head) tables for the fused kernel.

    cos_full : cos table tiled over heads.
    sin_lo   : -sin on each head's first-half lanes, 0 elsewhere.
    sin_hi   : +sin on each head's second-half lanes, 0 elsewhere.

    rotate-half RoPE for all heads at once is then
        t*cos_full + shift(t, +half)*sin_lo + shift(t, -half)*sin_hi
    where shift() is a *global* cyclic lane shift: the lanes that would leak
    across a head boundary are exactly the lanes where the sin table is 0.
    """
    half = d_head // 2
    inv_freq = 1.0 / (base ** (jnp.arange(half, dtype=jnp.float32) * 2.0 / d_head))
    ang = jnp.arange(n, dtype=jnp.float32)[:, None] * inv_freq[None, :]    # (n, half)
    zeros = jnp.zeros_like(ang)
    cos = jnp.concatenate([jnp.cos(ang), jnp.cos(ang)], axis=-1)           # (n, d_head)
    sin_lo = jnp.concatenate([-jnp.sin(ang), zeros], axis=-1)              # (n, d_head)
    sin_hi = jnp.concatenate([zeros, jnp.sin(ang)], axis=-1)               # (n, d_head)
    tile = lambda t: jnp.tile(t, (1, n_heads))                             # (n, D)
    return tile(cos), tile(sin_lo), tile(sin_hi)


# ----------------------------------------------------------------------------
# Pallas kernel: one batch element per grid step
# ----------------------------------------------------------------------------
def _attn_kernel(x_ref, wqkv_ref, wout_ref, bout_ref, scale_q_ref, scale_k_ref,
                 cos_ref, sin_lo_ref, sin_hi_ref, mask_dh_ref, mask_hd_ref,
                 o_ref, *, n_heads, d_model):
    d_head = d_model // n_heads
    half = d_head // 2
    f32 = jnp.float32
    bf16 = jnp.bfloat16

    x = x_ref[0]                                                   # (n, d) f32

    # QKV projection on the MXU: bf16 operands, f32 accumulation.
    qkv = jnp.dot(x.astype(bf16), wqkv_ref[...], preferred_element_type=f32)
    q = qkv[:, :d_model]          # lane-aligned slices when d_model % 128 == 0
    k = qkv[:, d_model:2 * d_model]
    v = qkv[:, 2 * d_model:]

    mask_dh = mask_dh_ref[...]    # (d, h): per-head reduction (0/1) matrix
    mask_hd = mask_hd_ref[...]    # (h, d): per-head broadcast (0/1) matrix

    def l2norm(t):
        # Norm(): F.normalize over each head's channels, done lane-dense for
        # all heads at once via two tiny mask matmuls (idle MXU) + EUP rsqrt.
        ss = jnp.dot(t * t, mask_dh, preferred_element_type=f32)   # (n, h)
        inv = jax.lax.rsqrt(jnp.maximum(ss, 1e-24))                # == 1/max(||t||, 1e-12)
        return t * jnp.dot(inv, mask_hd, preferred_element_type=f32)

    cos = cos_ref[...]
    sin_lo = sin_lo_ref[...]
    sin_hi = sin_hi_ref[...]

    def rope(t):
        # rotate-half RoPE for all heads at once on the flat (n, d) layout;
        # cross-head leakage of the global cyclic shifts is masked by the
        # zeros baked into sin_lo / sin_hi.
        # TODO(synk): use pltpu.roll for the shifts (XLU slot) when d_head is
        # a multiple of 128; slice+concat lowers robustly at small shapes.
        up = jnp.concatenate([t[:, half:], t[:, :half]], axis=1)    # t[:, i+half]
        dn = jnp.concatenate([t[:, -half:], t[:, :-half]], axis=1)  # t[:, i-half]
        return t * cos + up * sin_lo + dn * sin_hi

    # qk-norm + learned per-channel scale + RoPE.  sqrt(d_head) (the module's
    # *multiplicative* attention scale) is folded into scale_q on the host;
    # RoPE is linear so the fold is exact.
    q = rope(l2norm(q) * scale_q_ref[...])
    k = rope(l2norm(k) * scale_k_ref[...])

    qb = q.astype(bf16)
    kb = k.astype(bf16)

    # Per-head scores + softmax.  Only a (n, 1) column-sum stays live per
    # head: the module's literal output einsum 'bhnm,bhmd->bhmd' reduces to
    # v * column-sum(softmax), so there is no P.V matmul and no per-head
    # output concat.
    cols = []
    for h in range(n_heads):      # static unroll; minimal live state per head
        lo = h * d_head
        qh = qb[:, lo:lo + d_head]
        kh = kb[:, lo:lo + d_head]
        # sT[m, n] = k_m . q_n  (bf16 MXU matmul; softmax axis m on sublanes).
        sT = jnp.einsum('md,nd->mn', kh, qh, preferred_element_type=f32)
        mmax = jnp.max(sT, axis=0, keepdims=True)                   # (1, n)
        e = jnp.exp(sT - mmax)
        p = e * pl.reciprocal(jnp.sum(e, axis=0, keepdims=True), approx=True)
        cols.append(jnp.sum(p, axis=1, keepdims=True))              # (n, 1), indexed by m
    colsum = jnp.concatenate(cols, axis=1)                          # (n, h)

    # Lane-dense head merge: out[m, h*dh+j] = v[m, h*dh+j] * colsum[m, h].
    merged = v * jnp.dot(colsum, mask_hd, preferred_element_type=f32)

    out = jnp.dot(merged.astype(bf16), wout_ref[...],
                  preferred_element_type=f32) + bout_ref[...]
    o_ref[0] = out.astype(o_ref.dtype)


# ----------------------------------------------------------------------------
# Wrapper
# ----------------------------------------------------------------------------
def _attn_call(args, b, n, d, n_heads, single_buffer):
    def const_spec(shape):
        kwargs = {}
        if single_buffer:
            # Grid-invariant operands: a single VMEM buffer instead of the
            # default double-buffer halves the resident weight footprint.
            kwargs["pipeline_mode"] = pl.Buffered(1)
        return pl.BlockSpec(shape, lambda i: (0,) * len(shape), **kwargs)

    kernel = functools.partial(_attn_kernel, n_heads=n_heads, d_model=d)
    return pl.pallas_call(
        kernel,
        out_shape=jax.ShapeDtypeStruct((b, n, d), jnp.float32),
        grid_spec=pltpu.PrefetchScalarGridSpec(
            num_scalar_prefetch=0,
            grid=(b,),
            in_specs=[
                pl.BlockSpec((1, n, d), lambda i: (i, 0, 0)),    # x
                const_spec((d, 3 * d)),                          # Wqkv^T (bf16)
                const_spec((d, d)),                              # Wout^T (bf16)
                const_spec((1, d)),                              # b_out
                const_spec((1, d)),                              # scale_q (sqrt(dh) folded)
                const_spec((1, d)),                              # scale_k
                const_spec((n, d)),                              # cos table
                const_spec((n, d)),                              # signed sin (first half)
                const_spec((n, d)),                              # signed sin (second half)
                const_spec((d, n_heads)),                        # head reduce mask
                const_spec((n_heads, d)),                        # head broadcast mask
            ],
            out_specs=pl.BlockSpec((1, n, d), lambda i: (i, 0, 0)),
        ),
        compiler_params=pltpu.CompilerParams(
            dimension_semantics=("parallel",),
            vmem_limit_bytes=64 * 1024 * 1024),
    )(*args)


def attn_forward(x, w_qkv, w_out, b_out, scale_param, n_heads):
    """x: (B, N, D) f32; w_qkv: (3D, D); w_out: (D, D); b_out: (D,);
    scale_param: (n_heads, D // n_heads)."""
    b, n, d = x.shape
    d_head = d // n_heads
    scale_scale = d ** (-0.5)
    scale_init = 1.0
    attn_scale = d_head ** 0.5        # MultiHeadAttention *multiplies* by this

    # bf16 weights for the MXU (accumulation stays f32 inside the kernel).
    wqkv_t = w_qkv.T.astype(jnp.bfloat16)                 # (d, 3d)
    wout_t = w_out.T.astype(jnp.bfloat16)                 # (d, d)
    bout2d = b_out.reshape(1, d).astype(jnp.float32)      # (1, d)

    # get_scale(): scale * (scale_init / scale_scale), flattened lane-dense to
    # (1, d); sqrt(d_head) folded into the q-side scale (RoPE is linear).
    scale_flat = (scale_param * (scale_init / scale_scale)).reshape(1, d)
    scale_q = (scale_flat * attn_scale).astype(jnp.float32)
    scale_k = scale_flat.astype(jnp.float32)

    cos_f, sin_lo, sin_hi = rope_tables_flat(n, d_head, n_heads)

    # Per-head reduce / broadcast 0-1 masks (used on the MXU inside the kernel
    # for the L2-norm and the lane-dense head merge).
    mask_hd = jnp.repeat(jnp.eye(n_heads, dtype=jnp.float32), d_head, axis=1)  # (h, d)
    mask_dh = mask_hd.T                                                        # (d, h)

    args = (x, wqkv_t, wout_t, bout2d, scale_q, scale_k,
            cos_f, sin_lo, sin_hi, mask_dh, mask_hd)
    try:
        return _attn_call(args, b, n, d, n_heads, single_buffer=True)
    except Exception:
        # Graceful fallback for jax versions where pl.Buffered(1) on constant
        # blocks is not supported; semantics are identical.
        return _attn_call(args, b, n, d, n_heads, single_buffer=False)


# ----------------------------------------------------------------------------
# Pure-JAX reference (mirrors the PyTorch forward literally, in f32)
# ----------------------------------------------------------------------------
def attn_reference(x, w_qkv, w_out, b_out, scale_param, n_heads):
    b, n, d = x.shape
    d_head = d // n_heads
    scale_scale = d ** (-0.5)
    attn_scale = d_head ** 0.5

    qkv = x @ w_qkv.T
    q, k, v = jnp.split(qkv, 3, axis=-1)

    def hsplit(t):  # 'b n (h d) -> b h n d'
        return t.reshape(b, n, n_heads, d_head).transpose(0, 2, 1, 3)

    q, k, v = hsplit(q), hsplit(k), hsplit(v)

    scaler = (scale_param * (1.0 / scale_scale))[None, None]       # (1,1,h,dh)
    scaler = scaler.transpose(0, 2, 1, 3)                          # (1,h,1,dh)

    def l2norm(t):
        nrm = jnp.sqrt(jnp.sum(t * t, axis=-1, keepdims=True))
        return t / jnp.maximum(nrm, 1e-12)

    q = l2norm(q) * scaler
    k = l2norm(k) * scaler

    cos, sin = rope_tables(n, d_head)

    def rope(t):
        t1 = t[..., : d_head // 2]
        t2 = t[..., d_head // 2:]
        rot = jnp.concatenate([-t2, t1], axis=-1)
        return t * cos + rot * sin

    q, k = rope(q), rope(k)

    scores = jnp.einsum('bhnd,bhmd->bhnm', q, k) * attn_scale
    scores = jax.nn.softmax(scores, axis=-1)
    out = jnp.einsum('bhnm,bhmd->bhmd', scores, v)                 # literal module einsum
    out = out.transpose(0, 2, 1, 3).reshape(b, n, d)               # 'b h n d -> b n (h d)'
    return out @ w_out.T + b_out


# ----------------------------------------------------------------------------
if __name__ == "__main__":
    B, N, D, H = 2, 8, 32, 4          # d_head = 8
    DH = D // H

    key = jax.random.PRNGKey(0)
    kx, kw1, kw2, kb = jax.random.split(key, 4)

    x = jax.random.normal(kx, (B, N, D), dtype=jnp.float32)

    # Deterministic parameter init (torch nn.Linear-style uniform bounds).
    bound = 1.0 / np.sqrt(D)
    w_qkv = jax.random.uniform(kw1, (3 * D, D), jnp.float32, -bound, bound)
    w_out = jax.random.uniform(kw2, (D, D), jnp.float32, -bound, bound)
    b_out = jax.random.uniform(kb, (D,), jnp.float32, -bound, bound)
    scale_param = jnp.full((H, DH), D ** (-0.5), dtype=jnp.float32)  # nn.Parameter init

    out = attn_forward(x, w_qkv, w_out, b_out, scale_param, H)
    out = jax.block_until_ready(out)

    ref = attn_reference(x, w_qkv, w_out, b_out, scale_param, H)
    # Kernel uses bf16 MXU operands + approx EUP reciprocal; the reference is
    # pure f32, so the tolerance is relaxed accordingly (algorithmic errors
    # would be O(1), far above this threshold).
    np.testing.assert_allclose(np.asarray(out), np.asarray(ref),
                               rtol=5e-2, atol=5e-2)

    print("KERNEL_OK")
</pallas_src>

<mosaic_0001>
module attributes {stable_mosaic.version = 11 : i64} {
  func.func @_attn_kernel(%arg0: i32, %arg1: memref<1x8x32xf32, #tpu.memory_space<vmem>>, %arg2: memref<32x96xbf16, #tpu.memory_space<vmem>>, %arg3: memref<32x32xbf16, #tpu.memory_space<vmem>>, %arg4: memref<1x32xf32, #tpu.memory_space<vmem>>, %arg5: memref<1x32xf32, #tpu.memory_space<vmem>>, %arg6: memref<1x32xf32, #tpu.memory_space<vmem>>, %arg7: memref<8x32xf32, #tpu.memory_space<vmem>>, %arg8: memref<8x32xf32, #tpu.memory_space<vmem>>, %arg9: memref<8x32xf32, #tpu.memory_space<vmem>>, %arg10: memref<32x4xf32, #tpu.memory_space<vmem>>, %arg11: memref<4x32xf32, #tpu.memory_space<vmem>>, %arg12: memref<1x8x32xf32, #tpu.memory_space<vmem>>) attributes {dimension_semantics = [#tpu.dimension_semantics<parallel>], iteration_bounds = array<i64: 2>, scalar_prefetch = 0 : i64, scratch_operands = 0 : i64, tpu.core_type = #tpu.core_type<tc>, window_params = [{transform_indices = @transform_0, window_bounds = array<i64: 1, 8, 32>}, {pipeline_mode = #tpu.pipeline_mode<synchronous>, transform_indices = @transform_1, window_bounds = array<i64: 32, 96>}, {pipeline_mode = #tpu.pipeline_mode<synchronous>, transform_indices = @transform_2, window_bounds = array<i64: 32, 32>}, {pipeline_mode = #tpu.pipeline_mode<synchronous>, transform_indices = @transform_3, window_bounds = array<i64: 1, 32>}, {pipeline_mode = #tpu.pipeline_mode<synchronous>, transform_indices = @transform_4, window_bounds = array<i64: 1, 32>}, {pipeline_mode = #tpu.pipeline_mode<synchronous>, transform_indices = @transform_5, window_bounds = array<i64: 1, 32>}, {pipeline_mode = #tpu.pipeline_mode<synchronous>, transform_indices = @transform_6, window_bounds = array<i64: 8, 32>}, {pipeline_mode = #tpu.pipeline_mode<synchronous>, transform_indices = @transform_7, window_bounds = array<i64: 8, 32>}, {pipeline_mode = #tpu.pipeline_mode<synchronous>, transform_indices = @transform_8, window_bounds = array<i64: 8, 32>}, {pipeline_mode = #tpu.pipeline_mode<synchronous>, transform_indices = @transform_9, window_bounds = array<i64: 32, 4>}, {pipeline_mode = #tpu.pipeline_mode<synchronous>, transform_indices = @transform_10, window_bounds = array<i64: 4, 32>}, {transform_indices = @transform_11, window_bounds = array<i64: 1, 8, 32>}]} {
    %c0 = arith.constant 0 : index
    %c0_0 = arith.constant 0 : index
    %c0_1 = arith.constant 0 : index
    %0 = vector.load %arg1[%c0, %c0_0, %c0_1] : memref<1x8x32xf32, #tpu.memory_space<vmem>>, vector<1x8x32xf32>
    %1 = vector.shape_cast %0 : vector<1x8x32xf32> to vector<8x32xf32>
    %2 = arith.truncf %1 : vector<8x32xf32> to vector<8x32xbf16>
    %c0_2 = arith.constant 0 : index
    %c0_3 = arith.constant 0 : index
    %3 = vector.load %arg2[%c0_2, %c0_3] : memref<32x96xbf16, #tpu.memory_space<vmem>>, vector<32x96xbf16>
    %cst = arith.constant dense<0.000000e+00> : vector<8x96xf32>
    %4 = tpu.matmul %2, %3, %cst {dimension_numbers = #tpu.dot_dimension_numbers<[1], [0], [0], [1], [0, 0, 1, 1], [], []>} : vector<8x32xbf16>, vector<32x96xbf16>, vector<8x96xf32> -> vector<8x96xf32>
    %5 = vector.extract_strided_slice %4 {offsets = [0, 0], sizes = [8, 32], strides = [1, 1]} : vector<8x96xf32> to vector<8x32xf32>
    %6 = vector.extract_strided_slice %4 {offsets = [0, 32], sizes = [8, 32], strides = [1, 1]} : vector<8x96xf32> to vector<8x32xf32>
    %7 = vector.extract_strided_slice %4 {offsets = [0, 64], sizes = [8, 32], strides = [1, 1]} : vector<8x96xf32> to vector<8x32xf32>
    %c0_4 = arith.constant 0 : index
    %c0_5 = arith.constant 0 : index
    %8 = vector.load %arg10[%c0_4, %c0_5] : memref<32x4xf32, #tpu.memory_space<vmem>>, vector<32x4xf32>
    %c0_6 = arith.constant 0 : index
    %c0_7 = arith.constant 0 : index
    %9 = vector.load %arg11[%c0_6, %c0_7] : memref<4x32xf32, #tpu.memory_space<vmem>>, vector<4x32xf32>
    %c0_8 = arith.constant 0 : index
    %c0_9 = arith.constant 0 : index
    %10 = vector.load %arg7[%c0_8, %c0_9] : memref<8x32xf32, #tpu.memory_space<vmem>>, vector<8x32xf32>
    %c0_10 = arith.constant 0 : index
    %c0_11 = arith.constant 0 : index
    %11 = vector.load %arg8[%c0_10, %c0_11] : memref<8x32xf32, #tpu.memory_space<vmem>>, vector<8x32xf32>
    %c0_12 = arith.constant 0 : index
    %c0_13 = arith.constant 0 : index
    %12 = vector.load %arg9[%c0_12, %c0_13] : memref<8x32xf32, #tpu.memory_space<vmem>>, vector<8x32xf32>
    %13 = arith.mulf %5, %5 : vector<8x32xf32>
    %cst_14 = arith.constant dense<0.000000e+00> : vector<8x4xf32>
    %14 = tpu.matmul %13, %8, %cst_14 {dimension_numbers = #tpu.dot_dimension_numbers<[1], [0], [0], [1], [0, 0, 1, 1], [], []>} : vector<8x32xf32>, vector<32x4xf32>, vector<8x4xf32> -> vector<8x4xf32>
    %cst_15 = arith.constant 1.000000e-24 : f32
    %15 = vector.broadcast %cst_15 : f32 to vector<8x4xf32>
    %16 = arith.maximumf %14, %15 : vector<8x4xf32>
    %17 = math.rsqrt %16 : vector<8x4xf32>
    %cst_16 = arith.constant dense<0.000000e+00> : vector<8x32xf32>
    %18 = tpu.matmul %17, %9, %cst_16 {dimension_numbers = #tpu.dot_dimension_numbers<[1], [0], [0], [1], [0, 0, 1, 1], [], []>} : vector<8x4xf32>, vector<4x32xf32>, vector<8x32xf32> -> vector<8x32xf32>
    %19 = arith.mulf %5, %18 : vector<8x32xf32>
    %c0_17 = arith.constant 0 : index
    %c0_18 = arith.constant 0 : index
    %20 = vector.load %arg5[%c0_17, %c0_18] : memref<1x32xf32, #tpu.memory_space<vmem>>, vector<1x32xf32>
    %21 = vector.broadcast %20 : vector<1x32xf32> to vector<8x32xf32>
    %22 = arith.mulf %19, %21 : vector<8x32xf32>
    %23 = vector.extract_strided_slice %22 {offsets = [0, 4], sizes = [8, 28], strides = [1, 1]} : vector<8x32xf32> to vector<8x28xf32>
    %24 = vector.extract_strided_slice %22 {offsets = [0, 0], sizes = [8, 4], strides = [1, 1]} : vector<8x32xf32> to vector<8x4xf32>
    %25 = tpu.concatenate %23, %24 in 1 : vector<8x28xf32>, vector<8x4xf32> -> vector<8x32xf32>
    %26 = vector.extract_strided_slice %22 {offsets = [0, 28], sizes = [8, 4], strides = [1, 1]} : vector<8x32xf32> to vector<8x4xf32>
    %27 = vector.extract_strided_slice %22 {offsets = [0, 0], sizes = [8, 28], strides = [1, 1]} : vector<8x32xf32> to vector<8x28xf32>
    %28 = tpu.concatenate %26, %27 in 1 : vector<8x4xf32>, vector<8x28xf32> -> vector<8x32xf32>
    %29 = arith.mulf %22, %10 : vector<8x32xf32>
    %30 = arith.mulf %25, %11 : vector<8x32xf32>
    %31 = arith.addf %29, %30 : vector<8x32xf32>
    %32 = arith.mulf %28, %12 : vector<8x32xf32>
    %33 = arith.addf %31, %32 : vector<8x32xf32>
    %34 = arith.mulf %6, %6 : vector<8x32xf32>
    %cst_19 = arith.constant dense<0.000000e+00> : vector<8x4xf32>
    %35 = tpu.matmul %34, %8, %cst_19 {dimension_numbers = #tpu.dot_dimension_numbers<[1], [0], [0], [1], [0, 0, 1, 1], [], []>} : vector<8x32xf32>, vector<32x4xf32>, vector<8x4xf32> -> vector<8x4xf32>
    %cst_20 = arith.constant 1.000000e-24 : f32
    %36 = vector.broadcast %cst_20 : f32 to vector<8x4xf32>
    %37 = arith.maximumf %35, %36 : vector<8x4xf32>
    %38 = math.rsqrt %37 : vector<8x4xf32>
    %cst_21 = arith.constant dense<0.000000e+00> : vector<8x32xf32>
    %39 = tpu.matmul %38, %9, %cst_21 {dimension_numbers = #tpu.dot_dimension_numbers<[1], [0], [0], [1], [0, 0, 1, 1], [], []>} : vector<8x4xf32>, vector<4x32xf32>, vector<8x32xf32> -> vector<8x32xf32>
    %40 = arith.mulf %6, %39 : vector<8x32xf32>
    %c0_22 = arith.constant 0 : index
    %c0_23 = arith.constant 0 : index
    %41 = vector.load %arg6[%c0_22, %c0_23] : memref<1x32xf32, #tpu.memory_space<vmem>>, vector<1x32xf32>
    %42 = vector.broadcast %41 : vector<1x32xf32> to vector<8x32xf32>
    %43 = arith.mulf %40, %42 : vector<8x32xf32>
    %44 = vector.extract_strided_slice %43 {offsets = [0, 4], sizes = [8, 28], strides = [1, 1]} : vector<8x32xf32> to vector<8x28xf32>
    %45 = vector.extract_strided_slice %43 {offsets = [0, 0], sizes = [8, 4], strides = [1, 1]} : vector<8x32xf32> to vector<8x4xf32>
    %46 = tpu.concatenate %44, %45 in 1 : vector<8x28xf32>, vector<8x4xf32> -> vector<8x32xf32>
    %47 = vector.extract_strided_slice %43 {offsets = [0, 28], sizes = [8, 4], strides = [1, 1]} : vector<8x32xf32> to vector<8x4xf32>
    %48 = vector.extract_strided_slice %43 {offsets = [0, 0], sizes = [8, 28], strides = [1, 1]} : vector<8x32xf32> to vector<8x28xf32>
    %49 = tpu.concatenate %47, %48 in 1 : vector<8x4xf32>, vector<8x28xf32> -> vector<8x32xf32>
    %50 = arith.mulf %43, %10 : vector<8x32xf32>
    %51 = arith.mulf %46, %11 : vector<8x32xf32>
    %52 = arith.addf %50, %51 : vector<8x32xf32>
    %53 = arith.mulf %49, %12 : vector<8x32xf32>
    %54 = arith.addf %52, %53 : vector<8x32xf32>
    %55 = arith.truncf %33 : vector<8x32xf32> to vector<8x32xbf16>
    %56 = arith.truncf %54 : vector<8x32xf32> to vector<8x32xbf16>
    %57 = vector.extract_strided_slice %55 {offsets = [0, 0], sizes = [8, 8], strides = [1, 1]} : vector<8x32xbf16> to vector<8x8xbf16>
    %58 = vector.extract_strided_slice %56 {offsets = [0, 0], sizes = [8, 8], strides = [1, 1]} : vector<8x32xbf16> to vector<8x8xbf16>
    "tpu.trace_start"() <{level = 10 : i32, message = "md,nd->mn"}> : () -> ()
    %cst_24 = arith.constant dense<0.000000e+00> : vector<8x8xf32>
    %59 = tpu.matmul %58, %57, %cst_24 {dimension_numbers = #tpu.dot_dimension_numbers<[1], [1], [0], [0], [0, 0, 1, 0], [], []>} : vector<8x8xbf16>, vector<8x8xbf16>, vector<8x8xf32> -> vector<8x8xf32>
    "tpu.trace_stop"() : () -> ()
    %cst_25 = arith.constant dense<0xFF800000> : vector<8xf32>
    %60 = vector.multi_reduction <maximumf>, %59, %cst_25 [0] : vector<8x8xf32> to vector<8xf32>
    %61 = vector.shape_cast %60 : vector<8xf32> to vector<1x8xf32>
    %62 = vector.broadcast %61 : vector<1x8xf32> to vector<8x8xf32>
    %63 = arith.subf %59, %62 : vector<8x8xf32>
    %64 = math.exp %63 : vector<8x8xf32>
    %cst_26 = arith.constant dense<0.000000e+00> : vector<8xf32>
    %65 = vector.multi_reduction <add>, %64, %cst_26 [0] : vector<8x8xf32> to vector<8xf32>
    %66 = vector.shape_cast %65 : vector<8xf32> to vector<1x8xf32>
    %67 = tpu.reciprocal %66 {approx = true} : vector<1x8xf32> -> vector<1x8xf32>
    %68 = vector.broadcast %67 : vector<1x8xf32> to vector<8x8xf32>
    %69 = arith.mulf %64, %68 : vector<8x8xf32>
    %cst_27 = arith.constant dense<0.000000e+00> : vector<8xf32>
    %70 = vector.multi_reduction <add>, %69, %cst_27 [1] : vector<8x8xf32> to vector<8xf32>
    %71 = vector.shape_cast %70 : vector<8xf32> to vector<8x1xf32>
    %72 = vector.extract_strided_slice %55 {offsets = [0, 8], sizes = [8, 8], strides = [1, 1]} : vector<8x32xbf16> to vector<8x8xbf16>
    %73 = vector.extract_strided_slice %56 {offsets = [0, 8], sizes = [8, 8], strides = [1, 1]} : vector<8x32xbf16> to vector<8x8xbf16>
    "tpu.trace_start"() <{level = 10 : i32, message = "md,nd->mn"}> : () -> ()
    %cst_28 = arith.constant dense<0.000000e+00> : vector<8x8xf32>
    %74 = tpu.matmul %73, %72, %cst_28 {dimension_numbers = #tpu.dot_dimension_numbers<[1], [1], [0], [0], [0, 0, 1, 0], [], []>} : vector<8x8xbf16>, vector<8x8xbf16>, vector<8x8xf32> -> vector<8x8xf32>
    "tpu.trace_stop"() : () -> ()
    %cst_29 = arith.constant dense<0xFF800000> : vector<8xf32>
    %75 = vector.multi_reduction <maximumf>, %74, %cst_29 [0] : vector<8x8xf32> to vector<8xf32>
    %76 = vector.shape_cast %75 : vector<8xf32> to vector<1x8xf32>
    %77 = vector.broadcast %76 : vector<1x8xf32> to vector<8x8xf32>
    %78 = arith.subf %74, %77 : vector<8x8xf32>
    %79 = math.exp %78 : vector<8x8xf32>
    %cst_30 = arith.constant dense<0.000000e+00> : vector<8xf32>
    %80 = vector.multi_reduction <add>, %79, %cst_30 [0] : vector<8x8xf32> to vector<8xf32>
    %81 = vector.shape_cast %80 : vector<8xf32> to vector<1x8xf32>
    %82 = tpu.reciprocal %81 {approx = true} : vector<1x8xf32> -> vector<1x8xf32>
    %83 = vector.broadcast %82 : vector<1x8xf32> to vector<8x8xf32>
    %84 = arith.mulf %79, %83 : vector<8x8xf32>
    %cst_31 = arith.constant dense<0.000000e+00> : vector<8xf32>
    %85 = vector.multi_reduction <add>, %84, %cst_31 [1] : vector<8x8xf32> to vector<8xf32>
    %86 = vector.shape_cast %85 : vector<8xf32> to vector<8x1xf32>
    %87 = vector.extract_strided_slice %55 {offsets = [0, 16], sizes = [8, 8], strides = [1, 1]} : vector<8x32xbf16> to vector<8x8xbf16>
    %88 = vector.extract_strided_slice %56 {offsets = [0, 16], sizes = [8, 8], strides = [1, 1]} : vector<8x32xbf16> to vector<8x8xbf16>
    "tpu.trace_start"() <{level = 10 : i32, message = "md,nd->mn"}> : () -> ()
    %cst_32 = arith.constant dense<0.000000e+00> : vector<8x8xf32>
    %89 = tpu.matmul %88, %87, %cst_32 {dimension_numbers = #tpu.dot_dimension_numbers<[1], [1], [0], [0], [0, 0, 1, 0], [], []>} : vector<8x8xbf16>, vector<8x8xbf16>, vector<8x8xf32> -> vector<8x8xf32>
    "tpu.trace_stop"() : () -> ()
    %cst_33 = arith.constant dense<0xFF800000> : vector<8xf32>
    %90 = vector.multi_reduction <maximumf>, %89, %cst_33 [0] : vector<8x8xf32> to vector<8xf32>
    %91 = vector.shape_cast %90 : vector<8xf32> to vector<1x8xf32>
    %92 = vector.broadcast %91 : vector<1x8xf32> to vector<8x8xf32>
    %93 = arith.subf %89, %92 : vector<8x8xf32>
    %94 = math.exp %93 : vector<8x8xf32>
    %cst_34 = arith.constant dense<0.000000e+00> : vector<8xf32>
    %95 = vector.multi_reduction <add>, %94, %cst_34 [0] : vector<8x8xf32> to vector<8xf32>
    %96 = vector.shape_cast %95 : vector<8xf32> to vector<1x8xf32>
    %97 = tpu.reciprocal %96 {approx = true} : vector<1x8xf32> -> vector<1x8xf32>
    %98 = vector.broadcast %97 : vector<1x8xf32> to vector<8x8xf32>
    %99 = arith.mulf %94, %98 : vector<8x8xf32>
    %cst_35 = arith.constant dense<0.000000e+00> : vector<8xf32>
    %100 = vector.multi_reduction <add>, %99, %cst_35 [1] : vector<8x8xf32> to vector<8xf32>
    %101 = vector.shape_cast %100 : vector<8xf32> to vector<8x1xf32>
    %102 = vector.extract_strided_slice %55 {offsets = [0, 24], sizes = [8, 8], strides = [1, 1]} : vector<8x32xbf16> to vector<8x8xbf16>
    %103 = vector.extract_strided_slice %56 {offsets = [0, 24], sizes = [8, 8], strides = [1, 1]} : vector<8x32xbf16> to vector<8x8xbf16>
    "tpu.trace_start"() <{level = 10 : i32, message = "md,nd->mn"}> : () -> ()
    %cst_36 = arith.constant dense<0.000000e+00> : vector<8x8xf32>
    %104 = tpu.matmul %103, %102, %cst_36 {dimension_numbers = #tpu.dot_dimension_numbers<[1], [1], [0], [0], [0, 0, 1, 0], [], []>} : vector<8x8xbf16>, vector<8x8xbf16>, vector<8x8xf32> -> vector<8x8xf32>
    "tpu.trace_stop"() : () -> ()
    %cst_37 = arith.constant dense<0xFF800000> : vector<8xf32>
    %105 = vector.multi_reduction <maximumf>, %104, %cst_37 [0] : vector<8x8xf32> to vector<8xf32>
    %106 = vector.shape_cast %105 : vector<8xf32> to vector<1x8xf32>
    %107 = vector.broadcast %106 : vector<1x8xf32> to vector<8x8xf32>
    %108 = arith.subf %104, %107 : vector<8x8xf32>
    %109 = math.exp %108 : vector<8x8xf32>
    %cst_38 = arith.constant dense<0.000000e+00> : vector<8xf32>
    %110 = vector.multi_reduction <add>, %109, %cst_38 [0] : vector<8x8xf32> to vector<8xf32>
    %111 = vector.shape_cast %110 : vector<8xf32> to vector<1x8xf32>
    %112 = tpu.reciprocal %111 {approx = true} : vector<1x8xf32> -> vector<1x8xf32>
    %113 = vector.broadcast %112 : vector<1x8xf32> to vector<8x8xf32>
    %114 = arith.mulf %109, %113 : vector<8x8xf32>
    %cst_39 = arith.constant dense<0.000000e+00> : vector<8xf32>
    %115 = vector.multi_reduction <add>, %114, %cst_39 [1] : vector<8x8xf32> to vector<8xf32>
    %116 = vector.shape_cast %115 : vector<8xf32> to vector<8x1xf32>
    %117 = tpu.concatenate %71, %86, %101, %116 in 1 : vector<8x1xf32>, vector<8x1xf32>, vector<8x1xf32>, vector<8x1xf32> -> vector<8x4xf32>
    %cst_40 = arith.constant dense<0.000000e+00> : vector<8x32xf32>
    %118 = tpu.matmul %117, %9, %cst_40 {dimension_numbers = #tpu.dot_dimension_numbers<[1], [0], [0], [1], [0, 0, 1, 1], [], []>} : vector<8x4xf32>, vector<4x32xf32>, vector<8x32xf32> -> vector<8x32xf32>
    %119 = arith.mulf %7, %118 : vector<8x32xf32>
    %120 = arith.truncf %119 : vector<8x32xf32> to vector<8x32xbf16>
    %c0_41 = arith.constant 0 : index
    %c0_42 = arith.constant 0 : index
    %121 = vector.load %arg3[%c0_41, %c0_42] : memref<32x32xbf16, #tpu.memory_space<vmem>>, vector<32x32xbf16>
    %cst_43 = arith.constant dense<0.000000e+00> : vector<8x32xf32>
    %122 = tpu.matmul %120, %121, %cst_43 {dimension_numbers = #tpu.dot_dimension_numbers<[1], [0], [0], [1], [0, 0, 1, 1], [], []>} : vector<8x32xbf16>, vector<32x32xbf16>, vector<8x32xf32> -> vector<8x32xf32>
    %c0_44 = arith.constant 0 : index
    %c0_45 = arith.constant 0 : index
    %123 = vector.load %arg4[%c0_44, %c0_45] : memref<1x32xf32, #tpu.memory_space<vmem>>, vector<1x32xf32>
    %124 = vector.broadcast %123 : vector<1x32xf32> to vector<8x32xf32>
    %125 = arith.addf %122, %124 : vector<8x32xf32>
    %c0_46 = arith.constant 0 : index
    %c0_47 = arith.constant 0 : index
    %c0_48 = arith.constant 0 : index
    %126 = vector.load %arg12[%c0_46, %c0_47, %c0_48] : memref<1x8x32xf32, #tpu.memory_space<vmem>>, vector<1x8x32xf32>
    %127 = vector.shape_cast %126 : vector<1x8x32xf32> to vector<8x32xf32>
    %128 = vector.shape_cast %125 : vector<8x32xf32> to vector<1x8x32xf32>
    tpu.vector_store %arg12[%c0_46, %c0_47, %c0_48], %128 {strides = array<i32>} : memref<1x8x32xf32, #tpu.memory_space<vmem>>, vector<1x8x32xf32>,
    return
  }
  func.func @transform_0(%arg0: i32) -> (i32, i32, i32) {
    %c0_i32 = arith.constant 0 : i32
    %c0_i32_0 = arith.constant 0 : i32
    %c0_i32_1 = arith.constant 0 : i32
    return %arg0, %c0_i32, %c0_i32_0 : i32, i32, i32
  }
  func.func @transform_1(%arg0: i32) -> (i32, i32) {
    %c0_i32 = arith.constant 0 : i32
    %c0_i32_0 = arith.constant 0 : i32
    %c0_i32_1 = arith.constant 0 : i32
    return %c0_i32, %c0_i32_0 : i32, i32
  }
  func.func @transform_2(%arg0: i32) -> (i32, i32) {
    %c0_i32 = arith.constant 0 : i32
    %c0_i32_0 = arith.constant 0 : i32
    %c0_i32_1 = arith.constant 0 : i32
    return %c0_i32, %c0_i32_0 : i32, i32
  }
  func.func @transform_3(%arg0: i32) -> (i32, i32) {
    %c0_i32 = arith.constant 0 : i32
    %c0_i32_0 = arith.constant 0 : i32
    %c0_i32_1 = arith.constant 0 : i32
    return %c0_i32, %c0_i32_0 : i32, i32
  }
  func.func @transform_4(%arg0: i32) -> (i32, i32) {
    %c0_i32 = arith.constant 0 : i32
    %c0_i32_0 = arith.constant 0 : i32
    %c0_i32_1 = arith.constant 0 : i32
    return %c0_i32, %c0_i32_0 : i32, i32
  }
  func.func @transform_5(%arg0: i32) -> (i32, i32) {
    %c0_i32 = arith.constant 0 : i32
    %c0_i32_0 = arith.constant 0 : i32
    %c0_i32_1 = arith.constant 0 : i32
    return %c0_i32, %c0_i32_0 : i32, i32
  }
  func.func @transform_6(%arg0: i32) -> (i32, i32) {
    %c0_i32 = arith.constant 0 : i32
    %c0_i32_0 = arith.constant 0 : i32
    %c0_i32_1 = arith.constant 0 : i32
    return %c0_i32, %c0_i32_0 : i32, i32
  }
  func.func @transform_7(%arg0: i32) -> (i32, i32) {
    %c0_i32 = arith.constant 0 : i32
    %c0_i32_0 = arith.constant 0 : i32
    %c0_i32_1 = arith.constant 0 : i32
    return %c0_i32, %c0_i32_0 : i32, i32
  }
  func.func @transform_8(%arg0: i32) -> (i32, i32) {
    %c0_i32 = arith.constant 0 : i32
    %c0_i32_0 = arith.constant 0 : i32
    %c0_i32_1 = arith.constant 0 : i32
    return %c0_i32, %c0_i32_0 : i32, i32
  }
  func.func @transform_9(%arg0: i32) -> (i32, i32) {
    %c0_i32 = arith.constant 0 : i32
    %c0_i32_0 = arith.constant 0 : i32
    %c0_i32_1 = arith.constant 0 : i32
    return %c0_i32, %c0_i32_0 : i32, i32
  }
  func.func @transform_10(%arg0: i32) -> (i32, i32) {
    %c0_i32 = arith.constant 0 : i32
    %c0_i32_0 = arith.constant 0 : i32
    %c0_i32_1 = arith.constant 0 : i32
    return %c0_i32, %c0_i32_0 : i32, i32
  }
  func.func @transform_11(%arg0: i32) -> (i32, i32, i32) {
    %c0_i32 = arith.constant 0 : i32
    %c0_i32_0 = arith.constant 0 : i32
    %c0_i32_1 = arith.constant 0 : i32
    return %arg0, %c0_i32, %c0_i32_0 : i32, i32, i32
  }
}

module attributes {stable_mosaic.version = 11 : i64} {
  func.func @_attn_kernel(%arg0: i32, %arg1: memref<1x8x32xf32, #tpu.memory_space<vmem>>, %arg2: memref<32x96xbf16, #tpu.memory_space<vmem>>, %arg3: memref<32x32xbf16, #tpu.memory_space<vmem>>, %arg4: memref<1x32xf32, #tpu.memory_space<vmem>>, %arg5: memref<1x32xf32, #tpu.memory_space<vmem>>, %arg6: memref<1x32xf32, #tpu.memory_space<vmem>>, %arg7: memref<8x32xf32, #tpu.memory_space<vmem>>, %arg8: memref<8x32xf32, #tpu.memory_space<vmem>>, %arg9: memref<8x32xf32, #tpu.memory_space<vmem>>, %arg10: memref<32x4xf32, #tpu.memory_space<vmem>>, %arg11: memref<4x32xf32, #tpu.memory_space<vmem>>, %arg12: memref<1x8x32xf32, #tpu.memory_space<vmem>>) attributes {dimension_semantics = [#tpu.dimension_semantics<parallel>], iteration_bounds = array<i64: 2>, scalar_prefetch = 0 : i64, scratch_operands = 0 : i64, tpu.core_type = #tpu.core_type<tc>, window_params = [{transform_indices = @transform_0, window_bounds = array<i64: 1, 8, 32>}, {pipeline_mode = #tpu.pipeline_mode<synchronous>, transform_indices = @transform_1, window_bounds = array<i64: 32, 96>}, {pipeline_mode = #tpu.pipeline_mode<synchronous>, transform_indices = @transform_2, window_bounds = array<i64: 32, 32>}, {pipeline_mode = #tpu.pipeline_mode<synchronous>, transform_indices = @transform_3, window_bounds = array<i64: 1, 32>}, {pipeline_mode = #tpu.pipeline_mode<synchronous>, transform_indices = @transform_4, window_bounds = array<i64: 1, 32>}, {pipeline_mode = #tpu.pipeline_mode<synchronous>, transform_indices = @transform_5, window_bounds = array<i64: 1, 32>}, {pipeline_mode = #tpu.pipeline_mode<synchronous>, transform_indices = @transform_6, window_bounds = array<i64: 8, 32>}, {pipeline_mode = #tpu.pipeline_mode<synchronous>, transform_indices = @transform_7, window_bounds = array<i64: 8, 32>}, {pipeline_mode = #tpu.pipeline_mode<synchronous>, transform_indices = @transform_8, window_bounds = array<i64: 8, 32>}, {pipeline_mode = #tpu.pipeline_mode<synchronous>, transform_indices = @transform_9, window_bounds = array<i64: 32, 4>}, {pipeline_mode = #tpu.pipeline_mode<synchronous>, transform_indices = @transform_10, window_bounds = array<i64: 4, 32>}, {transform_indices = @transform_11, window_bounds = array<i64: 1, 8, 32>}]} {
    %c0 = arith.constant 0 : index
    %c0_0 = arith.constant 0 : index
    %c0_1 = arith.constant 0 : index
    %0 = vector.load %arg1[%c0, %c0_0, %c0_1] : memref<1x8x32xf32, #tpu.memory_space<vmem>>, vector<1x8x32xf32>
    %1 = vector.shape_cast %0 : vector<1x8x32xf32> to vector<8x32xf32>
    %2 = arith.truncf %1 : vector<8x32xf32> to vector<8x32xbf16>
    %c0_2 = arith.constant 0 : index
    %c0_3 = arith.constant 0 : index
    %3 = vector.load %arg2[%c0_2, %c0_3] : memref<32x96xbf16, #tpu.memory_space<vmem>>, vector<32x96xbf16>
    %cst = arith.constant dense<0.000000e+00> : vector<8x96xf32>
    %4 = tpu.matmul %2, %3, %cst {dimension_numbers = #tpu.dot_dimension_numbers<[1], [0], [0], [1], [0, 0, 1, 1], [], []>} : vector<8x32xbf16>, vector<32x96xbf16>, vector<8x96xf32> -> vector<8x96xf32>
    %5 = vector.extract_strided_slice %4 {offsets = [0, 0], sizes = [8, 32], strides = [1, 1]} : vector<8x96xf32> to vector<8x32xf32>
    %6 = vector.extract_strided_slice %4 {offsets = [0, 32], sizes = [8, 32], strides = [1, 1]} : vector<8x96xf32> to vector<8x32xf32>
    %7 = vector.extract_strided_slice %4 {offsets = [0, 64], sizes = [8, 32], strides = [1, 1]} : vector<8x96xf32> to vector<8x32xf32>
    %c0_4 = arith.constant 0 : index
    %c0_5 = arith.constant 0 : index
    %8 = vector.load %arg10[%c0_4, %c0_5] : memref<32x4xf32, #tpu.memory_space<vmem>>, vector<32x4xf32>
    %c0_6 = arith.constant 0 : index
    %c0_7 = arith.constant 0 : index
    %9 = vector.load %arg11[%c0_6, %c0_7] : memref<4x32xf32, #tpu.memory_space<vmem>>, vector<4x32xf32>
    %c0_8 = arith.constant 0 : index
    %c0_9 = arith.constant 0 : index
    %10 = vector.load %arg7[%c0_8, %c0_9] : memref<8x32xf32, #tpu.memory_space<vmem>>, vector<8x32xf32>
    %c0_10 = arith.constant 0 : index
    %c0_11 = arith.constant 0 : index
    %11 = vector.load %arg8[%c0_10, %c0_11] : memref<8x32xf32, #tpu.memory_space<vmem>>, vector<8x32xf32>
    %c0_12 = arith.constant 0 : index
    %c0_13 = arith.constant 0 : index
    %12 = vector.load %arg9[%c0_12, %c0_13] : memref<8x32xf32, #tpu.memory_space<vmem>>, vector<8x32xf32>
    %13 = arith.mulf %5, %5 : vector<8x32xf32>
    %cst_14 = arith.constant dense<0.000000e+00> : vector<8x4xf32>
    %14 = tpu.matmul %13, %8, %cst_14 {dimension_numbers = #tpu.dot_dimension_numbers<[1], [0], [0], [1], [0, 0, 1, 1], [], []>} : vector<8x32xf32>, vector<32x4xf32>, vector<8x4xf32> -> vector<8x4xf32>
    %cst_15 = arith.constant 1.000000e-24 : f32
    %15 = vector.broadcast %cst_15 : f32 to vector<8x4xf32>
    %16 = arith.maximumf %14, %15 : vector<8x4xf32>
    %17 = math.rsqrt %16 : vector<8x4xf32>
    %cst_16 = arith.constant dense<0.000000e+00> : vector<8x32xf32>
    %18 = tpu.matmul %17, %9, %cst_16 {dimension_numbers = #tpu.dot_dimension_numbers<[1], [0], [0], [1], [0, 0, 1, 1], [], []>} : vector<8x4xf32>, vector<4x32xf32>, vector<8x32xf32> -> vector<8x32xf32>
    %19 = arith.mulf %5, %18 : vector<8x32xf32>
    %c0_17 = arith.constant 0 : index
    %c0_18 = arith.constant 0 : index
    %20 = vector.load %arg5[%c0_17, %c0_18] : memref<1x32xf32, #tpu.memory_space<vmem>>, vector<1x32xf32>
    %21 = vector.broadcast %20 : vector<1x32xf32> to vector<8x32xf32>
    %22 = arith.mulf %19, %21 : vector<8x32xf32>
    %23 = vector.extract_strided_slice %22 {offsets = [0, 4], sizes = [8, 28], strides = [1, 1]} : vector<8x32xf32> to vector<8x28xf32>
    %24 = vector.extract_strided_slice %22 {offsets = [0, 0], sizes = [8, 4], strides = [1, 1]} : vector<8x32xf32> to vector<8x4xf32>
    %25 = tpu.concatenate %23, %24 in 1 : vector<8x28xf32>, vector<8x4xf32> -> vector<8x32xf32>
    %26 = vector.extract_strided_slice %22 {offsets = [0, 28], sizes = [8, 4], strides = [1, 1]} : vector<8x32xf32> to vector<8x4xf32>
    %27 = vector.extract_strided_slice %22 {offsets = [0, 0], sizes = [8, 28], strides = [1, 1]} : vector<8x32xf32> to vector<8x28xf32>
    %28 = tpu.concatenate %26, %27 in 1 : vector<8x4xf32>, vector<8x28xf32> -> vector<8x32xf32>
    %29 = arith.mulf %22, %10 : vector<8x32xf32>
    %30 = arith.mulf %25, %11 : vector<8x32xf32>
    %31 = arith.addf %29, %30 : vector<8x32xf32>
    %32 = arith.mulf %28, %12 : vector<8x32xf32>
    %33 = arith.addf %31, %32 : vector<8x32xf32>
    %34 = arith.mulf %6, %6 : vector<8x32xf32>
    %cst_19 = arith.constant dense<0.000000e+00> : vector<8x4xf32>
    %35 = tpu.matmul %34, %8, %cst_19 {dimension_numbers = #tpu.dot_dimension_numbers<[1], [0], [0], [1], [0, 0, 1, 1], [], []>} : vector<8x32xf32>, vector<32x4xf32>, vector<8x4xf32> -> vector<8x4xf32>
    %cst_20 = arith.constant 1.000000e-24 : f32
    %36 = vector.broadcast %cst_20 : f32 to vector<8x4xf32>
    %37 = arith.maximumf %35, %36 : vector<8x4xf32>
    %38 = math.rsqrt %37 : vector<8x4xf32>
    %cst_21 = arith.constant dense<0.000000e+00> : vector<8x32xf32>
    %39 = tpu.matmul %38, %9, %cst_21 {dimension_numbers = #tpu.dot_dimension_numbers<[1], [0], [0], [1], [0, 0, 1, 1], [], []>} : vector<8x4xf32>, vector<4x32xf32>, vector<8x32xf32> -> vector<8x32xf32>
    %40 = arith.mulf %6, %39 : vector<8x32xf32>
    %c0_22 = arith.constant 0 : index
    %c0_23 = arith.constant 0 : index
    %41 = vector.load %arg6[%c0_22, %c0_23] : memref<1x32xf32, #tpu.memory_space<vmem>>, vector<1x32xf32>
    %42 = vector.broadcast %41 : vector<1x32xf32> to vector<8x32xf32>
    %43 = arith.mulf %40, %42 : vector<8x32xf32>
    %44 = vector.extract_strided_slice %43 {offsets = [0, 4], sizes = [8, 28], strides = [1, 1]} : vector<8x32xf32> to vector<8x28xf32>
    %45 = vector.extract_strided_slice %43 {offsets = [0, 0], sizes = [8, 4], strides = [1, 1]} : vector<8x32xf32> to vector<8x4xf32>
    %46 = tpu.concatenate %44, %45 in 1 : vector<8x28xf32>, vector<8x4xf32> -> vector<8x32xf32>
    %47 = vector.extract_strided_slice %43 {offsets = [0, 28], sizes = [8, 4], strides = [1, 1]} : vector<8x32xf32> to vector<8x4xf32>
    %48 = vector.extract_strided_slice %43 {offsets = [0, 0], sizes = [8, 28], strides = [1, 1]} : vector<8x32xf32> to vector<8x28xf32>
    %49 = tpu.concatenate %47, %48 in 1 : vector<8x4xf32>, vector<8x28xf32> -> vector<8x32xf32>
    %50 = arith.mulf %43, %10 : vector<8x32xf32>
    %51 = arith.mulf %46, %11 : vector<8x32xf32>
    %52 = arith.addf %50, %51 : vector<8x32xf32>
    %53 = arith.mulf %49, %12 : vector<8x32xf32>
    %54 = arith.addf %52, %53 : vector<8x32xf32>
    %55 = arith.truncf %33 : vector<8x32xf32> to vector<8x32xbf16>
    %56 = arith.truncf %54 : vector<8x32xf32> to vector<8x32xbf16>
    %57 = vector.extract_strided_slice %55 {offsets = [0, 0], sizes = [8, 8], strides = [1, 1]} : vector<8x32xbf16> to vector<8x8xbf16>
    %58 = vector.extract_strided_slice %56 {offsets = [0, 0], sizes = [8, 8], strides = [1, 1]} : vector<8x32xbf16> to vector<8x8xbf16>
    "tpu.trace_start"() <{level = 10 : i32, message = "md,nd->mn"}> : () -> ()
    %cst_24 = arith.constant dense<0.000000e+00> : vector<8x8xf32>
    %59 = tpu.matmul %58, %57, %cst_24 {dimension_numbers = #tpu.dot_dimension_numbers<[1], [1], [0], [0], [0, 0, 1, 0], [], []>} : vector<8x8xbf16>, vector<8x8xbf16>, vector<8x8xf32> -> vector<8x8xf32>
    "tpu.trace_stop"() : () -> ()
    %cst_25 = arith.constant dense<0xFF800000> : vector<8xf32>
    %60 = vector.multi_reduction <maximumf>, %59, %cst_25 [0] : vector<8x8xf32> to vector<8xf32>
    %61 = vector.shape_cast %60 : vector<8xf32> to vector<1x8xf32>
    %62 = vector.broadcast %61 : vector<1x8xf32> to vector<8x8xf32>
    %63 = arith.subf %59, %62 : vector<8x8xf32>
    %64 = math.exp %63 : vector<8x8xf32>
    %cst_26 = arith.constant dense<0.000000e+00> : vector<8xf32>
    %65 = vector.multi_reduction <add>, %64, %cst_26 [0] : vector<8x8xf32> to vector<8xf32>
    %66 = vector.shape_cast %65 : vector<8xf32> to vector<1x8xf32>
    %67 = tpu.reciprocal %66 {approx = true} : vector<1x8xf32> -> vector<1x8xf32>
    %68 = vector.broadcast %67 : vector<1x8xf32> to vector<8x8xf32>
    %69 = arith.mulf %64, %68 : vector<8x8xf32>
    %cst_27 = arith.constant dense<0.000000e+00> : vector<8xf32>
    %70 = vector.multi_reduction <add>, %69, %cst_27 [1] : vector<8x8xf32> to vector<8xf32>
    %71 = vector.shape_cast %70 : vector<8xf32> to vector<8x1xf32>
    %72 = vector.extract_strided_slice %55 {offsets = [0, 8], sizes = [8, 8], strides = [1, 1]} : vector<8x32xbf16> to vector<8x8xbf16>
    %73 = vector.extract_strided_slice %56 {offsets = [0, 8], sizes = [8, 8], strides = [1, 1]} : vector<8x32xbf16> to vector<8x8xbf16>
    "tpu.trace_start"() <{level = 10 : i32, message = "md,nd->mn"}> : () -> ()
    %cst_28 = arith.constant dense<0.000000e+00> : vector<8x8xf32>
    %74 = tpu.matmul %73, %72, %cst_28 {dimension_numbers = #tpu.dot_dimension_numbers<[1], [1], [0], [0], [0, 0, 1, 0], [], []>} : vector<8x8xbf16>, vector<8x8xbf16>, vector<8x8xf32> -> vector<8x8xf32>
    "tpu.trace_stop"() : () -> ()
    %cst_29 = arith.constant dense<0xFF800000> : vector<8xf32>
    %75 = vector.multi_reduction <maximumf>, %74, %cst_29 [0] : vector<8x8xf32> to vector<8xf32>
    %76 = vector.shape_cast %75 : vector<8xf32> to vector<1x8xf32>
    %77 = vector.broadcast %76 : vector<1x8xf32> to vector<8x8xf32>
    %78 = arith.subf %74, %77 : vector<8x8xf32>
    %79 = math.exp %78 : vector<8x8xf32>
    %cst_30 = arith.constant dense<0.000000e+00> : vector<8xf32>
    %80 = vector.multi_reduction <add>, %79, %cst_30 [0] : vector<8x8xf32> to vector<8xf32>
    %81 = vector.shape_cast %80 : vector<8xf32> to vector<1x8xf32>
    %82 = tpu.reciprocal %81 {approx = true} : vector<1x8xf32> -> vector<1x8xf32>
    %83 = vector.broadcast %82 : vector<1x8xf32> to vector<8x8xf32>
    %84 = arith.mulf %79, %83 : vector<8x8xf32>
    %cst_31 = arith.constant dense<0.000000e+00> : vector<8xf32>
    %85 = vector.multi_reduction <add>, %84, %cst_31 [1] : vector<8x8xf32> to vector<8xf32>
    %86 = vector.shape_cast %85 : vector<8xf32> to vector<8x1xf32>
    %87 = vector.extract_strided_slice %55 {offsets = [0, 16], sizes = [8, 8], strides = [1, 1]} : vector<8x32xbf16> to vector<8x8xbf16>
    %88 = vector.extract_strided_slice %56 {offsets = [0, 16], sizes = [8, 8], strides = [1, 1]} : vector<8x32xbf16> to vector<8x8xbf16>
    "tpu.trace_start"() <{level = 10 : i32, message = "md,nd->mn"}> : () -> ()
    %cst_32 = arith.constant dense<0.000000e+00> : vector<8x8xf32>
    %89 = tpu.matmul %88, %87, %cst_32 {dimension_numbers = #tpu.dot_dimension_numbers<[1], [1], [0], [0], [0, 0, 1, 0], [], []>} : vector<8x8xbf16>, vector<8x8xbf16>, vector<8x8xf32> -> vector<8x8xf32>
    "tpu.trace_stop"() : () -> ()
    %cst_33 = arith.constant dense<0xFF800000> : vector<8xf32>
    %90 = vector.multi_reduction <maximumf>, %89, %cst_33 [0] : vector<8x8xf32> to vector<8xf32>
    %91 = vector.shape_cast %90 : vector<8xf32> to vector<1x8xf32>
    %92 = vector.broadcast %91 : vector<1x8xf32> to vector<8x8xf32>
    %93 = arith.subf %89, %92 : vector<8x8xf32>
    %94 = math.exp %93 : vector<8x8xf32>
    %cst_34 = arith.constant dense<0.000000e+00> : vector<8xf32>
    %95 = vector.multi_reduction <add>, %94, %cst_34 [0] : vector<8x8xf32> to vector<8xf32>
    %96 = vector.shape_cast %95 : vector<8xf32> to vector<1x8xf32>
    %97 = tpu.reciprocal %96 {approx = true} : vector<1x8xf32> -> vector<1x8xf32>
    %98 = vector.broadcast %97 : vector<1x8xf32> to vector<8x8xf32>
    %99 = arith.mulf %94, %98 : vector<8x8xf32>
    %cst_35 = arith.constant dense<0.000000e+00> : vector<8xf32>
    %100 = vector.multi_reduction <add>, %99, %cst_35 [1] : vector<8x8xf32> to vector<8xf32>
    %101 = vector.shape_cast %100 : vector<8xf32> to vector<8x1xf32>
    %102 = vector.extract_strided_slice %55 {offsets = [0, 24], sizes = [8, 8], strides = [1, 1]} : vector<8x32xbf16> to vector<8x8xbf16>
    %103 = vector.extract_strided_slice %56 {offsets = [0, 24], sizes = [8, 8], strides = [1, 1]} : vector<8x32xbf16> to vector<8x8xbf16>
    "tpu.trace_start"() <{level = 10 : i32, message = "md,nd->mn"}> : () -> ()
    %cst_36 = arith.constant dense<0.000000e+00> : vector<8x8xf32>
    %104 = tpu.matmul %103, %102, %cst_36 {dimension_numbers = #tpu.dot_dimension_numbers<[1], [1], [0], [0], [0, 0, 1, 0], [], []>} : vector<8x8xbf16>, vector<8x8xbf16>, vector<8x8xf32> -> vector<8x8xf32>
    "tpu.trace_stop"() : () -> ()
    %cst_37 = arith.constant dense<0xFF800000> : vector<8xf32>
    %105 = vector.multi_reduction <maximumf>, %104, %cst_37 [0] : vector<8x8xf32> to vector<8xf32>
    %106 = vector.shape_cast %105 : vector<8xf32> to vector<1x8xf32>
    %107 = vector.broadcast %106 : vector<1x8xf32> to vector<8x8xf32>
    %108 = arith.subf %104, %107 : vector<8x8xf32>
    %109 = math.exp %108 : vector<8x8xf32>
    %cst_38 = arith.constant dense<0.000000e+00> : vector<8xf32>
    %110 = vector.multi_reduction <add>, %109, %cst_38 [0] : vector<8x8xf32> to vector<8xf32>
    %111 = vector.shape_cast %110 : vector<8xf32> to vector<1x8xf32>
    %112 = tpu.reciprocal %111 {approx = true} : vector<1x8xf32> -> vector<1x8xf32>
    %113 = vector.broadcast %112 : vector<1x8xf32> to vector<8x8xf32>
    %114 = arith.mulf %109, %113 : vector<8x8xf32>
    %cst_39 = arith.constant dense<0.000000e+00> : vector<8xf32>
    %115 = vector.multi_reduction <add>, %114, %cst_39 [1] : vector<8x8xf32> to vector<8xf32>
    %116 = vector.shape_cast %115 : vector<8xf32> to vector<8x1xf32>
    %117 = tpu.concatenate %71, %86, %101, %116 in 1 : vector<8x1xf32>, vector<8x1xf32>, vector<8x1xf32>, vector<8x1xf32> -> vector<8x4xf32>
    %cst_40 = arith.constant dense<0.000000e+00> : vector<8x32xf32>
    %118 = tpu.matmul %117, %9, %cst_40 {dimension_numbers = #tpu.dot_dimension_numbers<[1], [0], [0], [1], [0, 0, 1, 1], [], []>} : vector<8x4xf32>, vector<4x32xf32>, vector<8x32xf32> -> vector<8x32xf32>
    %119 = arith.mulf %7, %118 : vector<8x32xf32>
    %120 = arith.truncf %119 : vector<8x32xf32> to vector<8x32xbf16>
    %c0_41 = arith.constant 0 : index
    %c0_42 = arith.constant 0 : index
    %121 = vector.load %arg3[%c0_41, %c0_42] : memref<32x32xbf16, #tpu.memory_space<vmem>>, vector<32x32xbf16>
    %cst_43 = arith.constant dense<0.000000e+00> : vector<8x32xf32>
    %122 = tpu.matmul %120, %121, %cst_43 {dimension_numbers = #tpu.dot_dimension_numbers<[1], [0], [0], [1], [0, 0, 1, 1], [], []>} : vector<8x32xbf16>, vector<32x32xbf16>, vector<8x32xf32> -> vector<8x32xf32>
    %c0_44 = arith.constant 0 : index
    %c0_45 = arith.constant 0 : index
    %123 = vector.load %arg4[%c0_44, %c0_45] : memref<1x32xf32, #tpu.memory_space<vmem>>, vector<1x32xf32>
    %124 = vector.broadcast %123 : vector<1x32xf32> to vector<8x32xf32>
    %125 = arith.addf %122, %124 : vector<8x32xf32>
    %c0_46 = arith.constant 0 : index
    %c0_47 = arith.constant 0 : index
    %c0_48 = arith.constant 0 : index
    %126 = vector.load %arg12[%c0_46, %c0_47, %c0_48] : memref<1x8x32xf32, #tpu.memory_space<vmem>>, vector<1x8x32xf32>
    %127 = vector.shape_cast %126 : vector<1x8x32xf32> to vector<8x32xf32>
    %128 = vector.shape_cast %125 : vector<8x32xf32> to vector<1x8x32xf32>
    tpu.vector_store %arg12[%c0_46, %c0_47, %c0_48], %128 {strides = array<i32>} : memref<1x8x32xf32, #tpu.memory_space<vmem>>, vector<1x8x32xf32>,
    return
  }
  func.func @transform_0(%arg0: i32) -> (i32, i32, i32) {
    %c0_i32 = arith.constant 0 : i32
    %c0_i32_0 = arith.constant 0 : i32
    %c0_i32_1 = arith.constant 0 : i32
    return %arg0, %c0_i32, %c0_i32_0 : i32, i32, i32
  }
  func.func @transform_1(%arg0: i32) -> (i32, i32) {
    %c0_i32 = arith.constant 0 : i32
    %c0_i32_0 = arith.constant 0 : i32
    %c0_i32_1 = arith.constant 0 : i32
    return %c0_i32, %c0_i32_0 : i32, i32
  }
  func.func @transform_2(%arg0: i32) -> (i32, i32) {
    %c0_i32 = arith.constant 0 : i32
    %c0_i32_0 = arith.constant 0 : i32
    %c0_i32_1 = arith.constant 0 : i32
    return %c0_i32, %c0_i32_0 : i32, i32
  }
  func.func @transform_3(%arg0: i32) -> (i32, i32) {
    %c0_i32 = arith.constant 0 : i32
    %c0_i32_0 = arith.constant 0 : i32
    %c0_i32_1 = arith.constant 0 : i32
    return %c0_i32, %c0_i32_0 : i32, i32
  }
  func.func @transform_4(%arg0: i32) -> (i32, i32) {
    %c0_i32 = arith.constant 0 : i32
    %c0_i32_0 = arith.constant 0 : i32
    %c0_i32_1 = arith.constant 0 : i32
    return %c0_i32, %c0_i32_0 : i32, i32
  }
  func.func @transform_5(%arg0: i32) -> (i32, i32) {
    %c0_i32 = arith.constant 0 : i32
    %c0_i32_0 = arith.constant 0 : i32
    %c0_i32_1 = arith.constant 0 : i32
    return %c0_i32, %c0_i32_0 : i32, i32
  }
  func.func @transform_6(%arg0: i32) -> (i32, i32) {
    %c0_i32 = arith.constant 0 : i32
    %c0_i32_0 = arith.constant 0 : i32
    %c0_i32_1 = arith.constant 0 : i32
    return %c0_i32, %c0_i32_0 : i32, i32
  }
  func.func @transform_7(%arg0: i32) -> (i32, i32) {
    %c0_i32 = arith.constant 0 : i32
    %c0_i32_0 = arith.constant 0 : i32
    %c0_i32_1 = arith.constant 0 : i32
    return %c0_i32, %c0_i32_0 : i32, i32
  }
  func.func @transform_8(%arg0: i32) -> (i32, i32) {
    %c0_i32 = arith.constant 0 : i32
    %c0_i32_0 = arith.constant 0 : i32
    %c0_i32_1 = arith.constant 0 : i32
    return %c0_i32, %c0_i32_0 : i32, i32
  }
  func.func @transform_9(%arg0: i32) -> (i32, i32) {
    %c0_i32 = arith.constant 0 : i32
    %c0_i32_0 = arith.constant 0 : i32
    %c0_i32_1 = arith.constant 0 : i32
    return %c0_i32, %c0_i32_0 : i32, i32
  }
  func.func @transform_10(%arg0: i32) -> (i32, i32) {
    %c0_i32 = arith.constant 0 : i32
    %c0_i32_0 = arith.constant 0 : i32
    %c0_i32_1 = arith.constant 0 : i32
    return %c0_i32, %c0_i32_0 : i32, i32
  }
  func.func @transform_11(%arg0: i32) -> (i32, i32, i32) {
    %c0_i32 = arith.constant 0 : i32
    %c0_i32_0 = arith.constant 0 : i32
    %c0_i32_1 = arith.constant 0 : i32
    return %arg0, %c0_i32, %c0_i32_0 : i32, i32, i32
  }
}

</mosaic_0001>

<bundles_post_ra>
// kernel: tpu_custom_call.1
= control target key start
LH: loop header
LB: loop body
LE: loop exit
PB: predicated region body
PF: predicated region fallthrough
CT: control target
= control target key end

     0   :  { %s2405_s0 = inlined_call_operand.vmem [shape: f32[2,8,32], index: 0, kind: input, shape index: {}]   ;;  %s2406_s1 = inlined_call_operand.vmem [shape: bf16[32,96], index: 1, kind: input, shape index: {}]   ;;  %s2407_s2 = inlined_call_operand.hbm [shape: bf16[32,32], index: 2, kind: input, shape index: {}]   ;;  %s2408_s3 = inlined_call_operand.hbm [shape: f32[1,32], index: 3, kind: input, shape index: {}]   ;;  %s2409_s4 = inlined_call_operand.hbm [shape: f32[1,32], index: 4, kind: input, shape index: {}]   ;;  %s2410_s5 = inlined_call_operand.hbm [shape: f32[1,32], index: 5, kind: input, shape index: {}]   ;;  %s2411_s6 = inlined_call_operand.vmem [shape: f32[8,32], index: 6, kind: input, shape index: {}]   ;;  %s2412_s7 = inlined_call_operand.vmem [shape: f32[8,32], index: 7, kind: input, shape index: {}]   ;;  %s2413_s8 = inlined_call_operand.hbm [shape: f32[8,32], index: 8, kind: input, shape index: {}]   ;;  %s2414_s9 = inlined_call_operand.vmem [shape: f32[32,4], index: 9, kind: input, shape index: {}]   ;;  %s2415_s10 = inlined_call_operand.hbm [shape: f32[4,32], index: 10, kind: input, shape index: {}]   ;;  %s2416_s11 = inlined_call_operand.hbm [shape: f32[2,8,32], index: 11, kind: output, shape index: {}]  }
   0x1   :  { %2421 = sst [smem:[#allocation21_spill]] %s2408_s3 }
   0x2   :  { %2422 = sst [smem:[#allocation22_spill]] %s2410_s5 }
   0x3   :  { %16 = vsyncpa [#allocation3], 0 }
   0x4   :  { %17 = vsyncpa [#allocation6], 0 }
   0x5   :  { %18 = vsyncpa [#allocation9], 0 }
   0x6   :  { %19 = vsyncpa [#allocation12], 0 }
   0x7   :  { %20 = vsyncpa [#allocation4], 0 }
   0x8   :  { %22 = vsyncpa [#allocation4 + $0x1], 0  ;;  %s2103_s17 = smov 0   ;;  %s2105_s18 = smov 0  }
   0x9   :  { %s2107_s19 = smov 0   ;;  %s2109_s20 = smov 0  }
   0xa LB: > { %2423 = sst [smem:[#allocation19_spill]] %s2011_s19  ;;  %s2124_s21 = sadd.s32 4294967295, %s2015_s20   ;;  %s2015_s20 = sphi %s2109_s20, %s2447_s20   ;;  %s2011_s19 = sphi %s2107_s19, %s2444_s19   ;;  %s2007_s18 = sphi %s2105_s18, %s2446_s18   ;;  %s2003_s17 = sphi %s2103_s17, %s2445_s17  }
   0xb   : > { %s1490_s22 = sadd.s32 4294967294, %s2015_s20   ;;  %s2128_s23 = sadd.s32 1, %s2015_s20  }
   0xc   : > { %s271_s24 = sadd.s32 1, %s2011_s19  ;;  %s268_s25 = ssub.s32 %s2015_s20, %s2128_s23 }
   0xd   : > { %p281_p0 = scmp.ne.s32.totalorder %s2011_s19, %s2007_s18  ;;  %p269_p1 = scmp.eq.s32.totalorder %s268_s25, 0 }
   0xe   : > { %p282_p2 = scmp.eq.s32.totalorder %s2124_s21, 1  ;;  %p287_p3 = scmp.ne.s32.totalorder %s2007_s18, %s2003_s17 }
   0xf   : > { %p288_p4 = scmp.eq.s32.totalorder %s1490_s22, 1  ;;  %p1491_p7 = scmp.ge.s32.totalorder %s2015_s20, 1 }
  0x10   : > { %s2139_s26 = scalar_select %p269_p1, %s2011_s19, %s271_s24  }
  0x11   : > { %p2141_p5 = por %p282_p2, %p281_p0  ;;  %p2145_p6 = por %p288_p4, %p287_p3 }
  0x12   : > { %2424 = sst [smem:[#allocation20_spill]] %s2139_s26  ;;  %p295_p8 = scmp.lt.s32.totalorder %s2015_s20, 3 }
  0x13   : > { %s2425_s27 = scalar_select %p2141_p5, 1, 0 }
  0x14   : > { %s2426_s28 = scalar_select %p2145_p6, 1, 0 }
  0x15   : > { %p2417_p9 = scmp.eq.s32.totalorder %s2124_s21, 0  ;;  %p2152_p10 = pnand %p1491_p7, %p295_p8 }
  0x16   : > { %s2017_s30 = smov [#allocation5]   ;;  %s2018_s13 = smov [#allocation8]  }
  0x17   : > { %s2427_s29 = scalar_select %p2152_p10, 1, 0 }
  0x18   : > { %s324_s12 = sshll.u32 %s2017_s30, 4  ;;  %p1666_p11 = pneg %p2152_p10  ;;  %s325_s12 = int_to_ptr.vmem [resolvable:$true] %s324_s12 }
  0x19   : > { %s346_s14 = sshll.u32 %s2018_s13, 4  ;;  %s2019_s16 = smov [#allocation2]   ;;  %s347_s14 = int_to_ptr.vmem [resolvable:$true] %s346_s14 }
  0x1a   : > { %p2160_p12 = pnand %p2417_p9, %p1666_p11  ;;  %s310_s22 = sshll.u32 %s2019_s16, 4  ;;  %s2164_s22 = int_to_ptr.vmem [resolvable:$true] %s310_s22 }
  0x1b   : > { %s1794_s25 = scalar_lea.vmem %s325_s12, 16  ;;  %s1801_s30 = scalar_lea.vmem %s325_s12, 32 }
  0x1c   : > { %p2168_p13 = pneg %p2160_p12  ;;  %p1795_p0 = scmp.ne.s32.totalorder %s325_s12, %s1794_s25 }
  0x1d   : > { %p1802_p3 = scmp.lt.s32.totalorder %s325_s12, %s325_s12  ;;  %p1803_p4 = scmp.lt.s32.totalorder %s1801_s30, %s1794_s25 }
  0x1e   : > { %p1797_p1 = pnand %p1795_p0, %p2168_p13 }
  0x1f   : > { %p1804_p7 = por %p1803_p4, %p1802_p3 }
  0x20   : > { %p1798_p2 = pneg %p1797_p1 }
  0x22   : > { %p1805_p8 = pnand %p1804_p7, %p1798_p2 }
  0x24   : > { %1808 = shalt.err (!%p1805_p8)
}
  0x25   : > { %s2430_s3 = sld [smem:[#allocation21_spill]]  ;;  %s1820_s26 = scalar_lea.vmem %s347_s14, 16 }
  0x26   : > { %p1821_p11 = scmp.ne.s32.totalorder %s347_s14, %s1820_s26  ;;  %s1827_s19 = scalar_lea.vmem %s347_s14, 32 }
  0x27   : > { %p1828_p0 = scmp.lt.s32.totalorder %s347_s14, %s347_s14  ;;  %p1829_p1 = scmp.lt.s32.totalorder %s1827_s19, %s1820_s26 }
  0x28   : > { %p1823_p9 = pnand %p1821_p11, %p2168_p13 }
  0x29   : > { %p1830_p5 = por %p1829_p1, %p1828_p0 }
  0x2a   : > { %p1824_p6 = pneg %p1823_p9 }
  0x2b   : > { %1672 = dma.hbm_to_vmem [thread:$0]  (!%p2160_p12), %s2430_s3, 16, %s325_s12, [#allocation6]  }
  0x2c   : > { %p1831_p10 = pnand %p1830_p5, %p1824_p6 }
  0x2e   : > { %1834 = shalt.err (!%p1831_p10)
}
  0x2f   : > { %s2431_s5 = sld [smem:[#allocation22_spill]]  ;;  %s1846_s12 = scalar_lea.vmem %s2164_s22, 256 }
  0x30   : > { %p1847_p2 = scmp.ne.s32.totalorder %s2164_s22, %s1846_s12  ;;  %p1854_p4 = scmp.lt.s32.totalorder %s2164_s22, %s2164_s22 }
  0x31   : > { %p1855_p7 = scmp.lt.s32.totalorder %s1846_s12, %s1846_s12 }
  0x32   : > { %p1849_p9 = pnand %p1847_p2, %p2168_p13 }
  0x33   : > { %p1856_p5 = por %p1855_p7, %p1854_p4 }
  0x34   : > { %p1850_p3 = pneg %p1849_p9 }
  0x35   : > { %1678 = dma.hbm_to_vmem [thread:$0]  (!%p2160_p12), %s2431_s5, 16, %s347_s14, [#allocation9]  }
  0x36   : > { %p1857_p6 = pnand %p1856_p5, %p1850_p3 }
  0x38   : > { %1860 = shalt.err (!%p1857_p6)
}
  0x39   : > { %s2020_s19 = smov 64   ;;  %s2021_s26 = smov 4  }
  0x3a   : > { %1669 = dma.hbm_to_vmem [thread:$0]  (!%p2160_p12), %s2407_s2, 256, %s2164_s22, [#allocation3], %s2020_s19, %s2020_s19, %s2021_s26  }
  0x3b   : > { %s2022_s14 = smov [#allocation7]   ;;  %s2023_s30 = smov [#allocation10]  }
  0x3c   : > { %s335_s25 = sshll.u32 %s2022_s14, 4  ;;  %s363_s3 = sshll.u32 %s2023_s30, 4  ;;  %s336_s25 = int_to_ptr.vmem [resolvable:$true] %s335_s25  ;;  %s364_s3 = int_to_ptr.vmem [resolvable:$true] %s363_s3 }
  0x3d   : > { %s1872_s5 = scalar_lea.vmem %s336_s25, 16  ;;  %s1879_s12 = scalar_lea.vmem %s336_s25, 32 }
  0x3e   : > { %p1873_p10 = scmp.ne.s32.totalorder %s336_s25, %s1872_s5  ;;  %p1880_p0 = scmp.lt.s32.totalorder %s336_s25, %s336_s25 }
  0x3f   : > { %p1881_p1 = scmp.lt.s32.totalorder %s1879_s12, %s1872_s5 }
  0x40   : > { %p1875_p8 = pnand %p1873_p10, %p2168_p13 }
  0x41   : > { %p1882_p2 = por %p1881_p1, %p1880_p0 }
  0x42   : > { %p1876_p11 = pneg %p1875_p8 }
  0x44   : > { %p1883_p9 = pnand %p1882_p2, %p1876_p11 }
  0x46   : > { %1886 = shalt.err (!%p1883_p9)
}
  0x47   : > { %1675 = dma.hbm_to_vmem [thread:$0]  (!%p2160_p12), %s2409_s4, 16, %s336_s25, [#allocation6]  }
  0x48   : > { %s1898_s19 = scalar_lea.vmem %s364_s3, 128  ;;  %p1906_p5 = scmp.lt.s32.totalorder %s364_s3, %s364_s3 }
  0x49   : > { %p1899_p3 = scmp.ne.s32.totalorder %s364_s3, %s1898_s19  ;;  %p1907_p6 = scmp.lt.s32.totalorder %s1898_s19, %s1898_s19 }
  0x4b   : > { %p1901_p4 = pnand %p1899_p3, %p2168_p13  ;;  %p1908_p10 = por %p1907_p6, %p1906_p5 }
  0x4d   : > { %p1902_p7 = pneg %p1901_p4 }
  0x4f   : > { %p1909_p8 = pnand %p1908_p10, %p1902_p7 }
  0x51   : > { %1912 = shalt.err (!%p1909_p8)
}
  0x52   : > { %1681 = dma.hbm_to_vmem [thread:$0]  (!%p2160_p12), %s2413_s8, 128, %s364_s3, [#allocation9]  }
  0x53   : > { %s2024_s16 = smov [#allocation11]  }
  0x54   : > { %s377_s14 = sshll.u32 %s2024_s16, 4  ;;  %s378_s14 = int_to_ptr.vmem [resolvable:$true] %s377_s14 }
  0x55   : > { %s1924_s25 = scalar_lea.vmem %s378_s14, 64  ;;  %p1932_p2 = scmp.lt.s32.totalorder %s378_s14, %s378_s14 }
  0x56   : > { %p1925_p11 = scmp.ne.s32.totalorder %s378_s14, %s1924_s25  ;;  %p1933_p9 = scmp.lt.s32.totalorder %s1924_s25, %s1924_s25 }
  0x58   : > { %p1927_p0 = pnand %p1925_p11, %p2168_p13  ;;  %p1934_p3 = por %p1933_p9, %p1932_p2 }
  0x5a   : > { %p1928_p1 = pneg %p1927_p0 }
  0x5c   : > { %p1935_p4 = pnand %p1934_p3, %p1928_p1 }
  0x5e   : > { %1938 = shalt.err (!%p1935_p4)
}
  0x5f   : > { %1684 = dma.hbm_to_vmem [thread:$0]  (!%p2160_p12), %s2415_s10, 64, %s378_s14, [#allocation12]  }
  0x60   : > { %p2432_p7 = scmp.ne.s32.totalorder %s2427_s29, 0 }
  0x61   : > { %p2433_p5 = scmp.eq.s32.totalorder (!%p2432_p7), %s2124_s21, 0 }
  0x62   : > { %397 = sbr.rel (%p2432_p7) target bundleno = 2351 (0x92f), region = 64 }
  0x67   : > { %1982 = dma.done.wait (%p2433_p5), [#allocation3], 256   ;;  %p2434_p13 = pmov %p2433_p5 }
  0x68   : > { %p2435_p6 = pmov %p2433_p5 }
  0x69   : > { %1984 = vsyncadd (%p2434_p13), [#allocation3], 4294967040 }
  0x6a   : > { %1986 = dma.done.wait (%p2435_p6), [#allocation6], 32   ;;  %p2436_p10 = pmov %p2433_p5 }
  0x6b   : > { %p2437_p8 = pmov %p2433_p5 }
  0x6c   : > { %1988 = vsyncadd (%p2436_p10), [#allocation6], 4294967264 }
  0x6d   : > { %1990 = dma.done.wait (%p2437_p8), [#allocation9], 144   ;;  %p2438_p12 = pmov %p2433_p5 }
  0x6e   : > { %p2439_p11 = pmov %p2433_p5 }
  0x6f   : > { %1992 = vsyncadd (%p2438_p12), [#allocation9], 4294967152 }
  0x70   : > { %1994 = dma.done.wait (%p2439_p11), [#allocation12], 64   ;;  %p2440_p0 = pmov %p2433_p5 }
  0x71   : > { %p456_p1 = scmp.lt.s32.totalorder %s2124_s21, 1  ;;  %v2025_v0 = vmov 0.0   ;;  %vm2026_vm0 = vmmov 0   ;;  %v1759_v1 = vld [vmem:[%s2406_s1 + $0x8] sm:$0xff]   ;;  %v1760_v2 = vld [vmem:[%s2406_s1] sm:$0xff]   ;;  %v526_v4 = vld [vmem:[%s2414_s9 + $0x18] sm:$0xff] }
  0x72   : > { %1996 = vsyncadd (%p2440_p0), [#allocation12], 4294967232  ;;  %1563 = vmatprep.subr.bf16.mxu0 %v2025_v0  ;;  %1567 = vmatprep.mubr.msk.bf16.mxu0 %vm2026_vm0, %v2025_v0  ;;  %v525_v5 = vld [vmem:[%s2414_s9 + $0x10] sm:$0xff]  ;;  %vm479_vm1 = vcmask 261120   ;;  %v524_v7 = vld [vmem:[%s2414_s9 + $0x8] sm:$0xff]  ;;  %s2027_s24 = smov 96  }
  0x73   : > { %s457_s3 = scalar_select %p456_p1, %s2124_s21, 1  ;;  %1571 = vmatprep.subr.mxu1 %v2025_v0  ;;  %1579 = vmatprep.mubr.msk.f32.mxu1 %vm2026_vm0, %v2025_v0  ;;  %v523_v8 = vld [vmem:[%s2414_s9] sm:$0xff]  ;;  %vm611_vm2 = vcmask 1043456   ;;  %vm607_vm3 = vcmask 31744   ;;  %v1518_v24 = vld [vmem:[#allocation8] ss:$0 sm:$0xff] }
  0x74   : > { %1564 = vmatpush3.bf16.msra.mxu0 %v1759_v1  ;;  %1572 = vmatpush3.msra.mxu1 %v526_v4  ;;  %v2287_v14 = vld [vmem:[#allocation11] sm:$0xf]  ;;  %s2029_s22 = smov 124   ;;  %s2030_s19 = smov 92   ;;  %v1514_v34 = vld [vmem:[#allocation7] ss:$0 sm:$0xff] }
  0x75   : > { %s1507_s29 = sshll.u32 %s457_s3, 3  ;;  %1565 = vmatprep.subr.bf16.mxu0 %v2025_v0  ;;  %1573 = vmatprep.subr.mxu1 %v2025_v0  ;;  %s2031_s5 = smov 100   ;;  %v528_v36 = vld [vmem:[%s2411_s6] sm:$0xff]  ;;  %vm701_vm4 = vcmask 228352   ;;  %v530_v42 = vld [vmem:[#allocation10] sm:$0xff]  ;;  %vm916_vm5 = vcmask 64512  }
  0x76   : > { %s459_s13 = scalar_lea.vmem %s2405_s0, %s1507_s29  ;;  %1574 = vmatpush3.msra.mxu1 %v525_v5  ;;  %s2032_s26 = smov 68   ;;  %v529_v37 = vld [vmem:[%s2412_s7] sm:$0xff]  ;;  %vm1202_vm6 = vcmask 7168   ;;  %vm1204_vm7 = vcmask 15360   ;;  %vm1206_vm8 = vcmask 23552  }
  0x77   : > { %v461_v3 = vld [vmem:[%s459_s13] sm:$0xff]  ;;  %1575 = vmatprep.subr.mxu1 %v2025_v0  ;;  %s2028_s13 = smov 32   ;;  %s2033_s16 = smov 28  }
  0x78   : > { %v462_v6 = vpack.c.bf16 %v461_v3, %v461_v3  ;;  %1566 = vmatpush3.bf16.msra.mxu0 %v1760_v2  ;;  %1576 = vmatpush3.msra.mxu1 %v524_v7  ;;  %s2034_s14 = smov 4   ;;  %s2035_s29 = smov 120  }
  0x79   : > { %1587 = vmatprep.subr.mxu0 %v2025_v0  ;;  %1577 = vmatprep.subr.mxu1 %v2025_v0  ;;  %s2036_s15 = smov 112   ;;  %p2441_p9 = scmp.ne.s32.totalorder %s2425_s27, 0 }
  0x7a   : > { %1578 = vmatpush3.msra.mxu1 %v523_v8  ;;  %875 = vrot.lane.b32.xlu1 %v1518_v24, %s2028_s13 }
  0x7b   : > { %1568 = vmatmul.mubr.msk.bf16.vlgmr.msra.gmra.mxu0 %vm479_vm1, %v462_v6  ;;  %1582 = vmatprep.subr.mxu1 %v2025_v0 }
  0x7c   : > { %1588 = vmatpush3.msra.mxu0 %v526_v4  ;;  %1595 = vmatprep.mubr.msk.f32.mxu0 %vm2026_vm0, %v2025_v0 }
  0x7d   : > { %1589 = vmatprep.subr.mxu0 %v2025_v0 }
  0x7e   : > { %1590 = vmatpush3.msra.mxu0 %v525_v5 }
  0x7f   : > { %1591 = vmatprep.subr.mxu0 %v2025_v0 }
  0x80   : > { %1592 = vmatpush3.msra.mxu0 %v524_v7 }
  0x81   : > { %1593 = vmatprep.subr.mxu0 %v2025_v0 }
  0x82   : > { %1594 = vmatpush3.msra.mxu0 %v523_v8 }
  0x83   : > { %1603 = vmatprep.subr.bf16.mxu0 %v2025_v0 }
  0xec   : > { %v876_v30 = vpop.permute.xlu1 %875 }
 0x13b   : > { %v2279_v9 = vpop.f32.mrf.mxu0 }
 0x13c   : > { %v531_v10 = vmul.f32 %v2279_v9, %v2279_v9 }
 0x13d   : > { %v1569_v11 = vpop.f32.mrf.mxu0 }
 0x13e   : > { %715 = vrot.lane.b32.xlu0 %v531_v10, %s2027_s24  ;;  %1580 = vmatmul.mubr.msk.f32.vlgmr.msra.gmra.mxu1 %vm479_vm1, %v531_v10 }
 0x13f   : > { %v520_v12 = vpop.f32.mrf.mxu0  ;;  %1584 = vmatprep.mubr.msk.f32.mxu1 %vm2026_vm0, %v2025_v0  ;;  %1583 = vmatpush3.msk.msra.mxu1 %vm611_vm2, %v2287_v14 }
 0x140   : > { %1598 = vmatprep.subr.mxu1 %v2025_v0 }
 0x141   : > { %v1570_v13 = vpop.f32.mrf.mxu0 }
 0x1b0   : > { %v716_v15 = vpop.permute.xlu0 %715 }
 0x1b1   : > { %1596 = vmatmul.mubr.msk.f32.vlgmr.msra.gmra.mxu0 %vm479_vm1, %v716_v15 }
 0x1b2   : > { %1605 = vmatprep.mubr.msk.bf16.mxu0 %vm2026_vm0, %v2025_v0 }
 0x1fe   : > { %v601_v16 = vpop.f32.mrf.mxu1 }
 0x1ff   : > { %v605_v17 = vmax.f32 %v601_v16, 1e-24 }
 0x200   : > { %v1581_v18 = vpop.f32.mrf.mxu1 }
 0x201   : > { %1763 = vrsqrt.f32 %v605_v17 }
 0x20e   : > { %v1764_v19 = vpop.eup %1763 }
 0x20f   : > { %1585 = vmatmul.mubr.msk.f32.vlgmr.msra.gmra.mxu1 %vm607_vm3, %v1764_v19 }
 0x210   : > { %1599 = vmatpush3.msk.msra.mxu1 %vm611_vm2, %v2287_v14  ;;  %1600 = vmatprep.mubr.msk.f32.mxu1 %vm2026_vm0, %v2025_v0 }
 0x211   : > { %1609 = vmatprep.subr.bf16.mxu1 %v2025_v0 }
 0x271   : > { %v785_v20 = vpop.f32.mrf.mxu0 }
 0x272   : > { %v789_v21 = vmax.f32 %v785_v20, 1e-24 }
 0x273   : > { %v1597_v22 = vpop.f32.mrf.mxu0 }
 0x274   : > { %1765 = vrsqrt.f32 %v789_v21 }
 0x281   : > { %v1766_v23 = vpop.eup %1765 }
 0x282   : > { %1601 = vmatmul.mubr.msk.f32.vlgmr.msra.gmra.mxu1 %vm607_vm3, %v1766_v23 }
 0x283   : > { %1611 = vmatprep.mubr.msk.bf16.mxu1 %vm2026_vm0, %v2025_v0 }
 0x2cf   : > { %v681_v25 = vpop.f32.mrf.mxu1 }
 0x2d0   : > { %v685_v33 = vmul.f32 %v681_v25, %v2279_v9 }
 0x2d1   : > { %v1586_v26 = vpop.f32.mrf.mxu1 }
 0x2d2   : > { %v693_v35 = vmul.f32 %v1514_v34, %v685_v33 }
 0x2d4   : > { %v710_v51 = vmul.f32 %v693_v35, %v528_v36 }
 0x342   : > { %v860_v27 = vpop.f32.mrf.mxu1 }
 0x343   : > { %865 = vrot.lane.b32.xlu0 %v860_v27, %s2028_s13 }
 0x344   : > { %v1602_v28 = vpop.f32.mrf.mxu1 }
 0x3b5   : > { %v866_v29 = vpop.permute.xlu0 %865 }
 0x3b6   : > { %v868_v31 = vmul.f32 %v866_v29, %v2279_v9 }
 0x3b8   : > { %v878_v32 = vmul.f32 %v876_v30, %v868_v31 }
 0x3ba   : > { %883 = vrot.lane.b32.xlu0 %v878_v32, %s2029_s22  ;;  %880 = vrot.lane.b32.xlu1 %v878_v32, %s2030_s19  ;;  %s2039_s19 = smov 88  }
 0x3be   : > { %890 = vrot.lane.b32.xlu0 %v878_v32, %s2031_s5  ;;  %887 = vrot.lane.b32.xlu1 %v878_v32, %s2032_s26  ;;  %s453_s26 = sand.u32 1, %s2007_s18  }
 0x3c2   : > { %698 = vrot.lane.b32.xlu0 %v693_v35, %s2033_s16  ;;  %695 = vrot.lane.b32.xlu1 %v693_v35, %s2029_s22  ;;  %s2038_s22 = smov 72   ;;  %s1506_s16 = sshll.u32 %s453_s26, 3 }
 0x3c3   : > { %s455_s25 = scalar_lea.vmem [#allocation13], %s1506_s16 }
 0x3c4   : > { %s1371_s30 = sshll.u32 %s455_s25, 4  ;;  %s2365_s30 = int_to_ptr.vmem [resolvable:$true] %s1371_s30 }
 0x3c6   : > { %706 = vrot.lane.b32.xlu0 %v693_v35, %s2034_s14  ;;  %703 = vrot.lane.b32.xlu1 %v693_v35, %s2031_s5  ;;  %s2040_s5 = smov 80   ;;  %s1530_s14 = sshll.u32 %s2124_s21, 7 }
 0x3c7   : > { %s1939_s21 = scalar_lea.vmem %s2365_s30, 128 }
 0x3c8   : > { %p1940_p2 = scmp.ne.s32.totalorder %s2365_s30, %s1939_s21 }
 0x3ca   : > { %895 = vrot.lane.b32.xlu1 %v528_v36, %s2028_s13  ;;  %p1941_p3 = pnand %p1940_p2, %p2441_p9 }
 0x3cc   : > { %p1942_p4 = pneg %p1941_p3 }
 0x42c   : > { %v884_v38 = vpop.permute.xlu0 %883  ;;  %v881_v39 = vpop.permute.xlu1 %880 }
 0x42d   : > { %v886_v40 = vsel %vm701_vm4, %v881_v39, %v884_v38 }
 0x42e   : > { %v899_v41 = vmul.f32 %v886_v40, %v529_v37 }
 0x430   : > { %v891_v43 = vpop.permute.xlu0 %890  ;;  %901 = vrot.lane.b32.xlu0 %v899_v41, %s2028_s13  ;;  %v888_v44 = vpop.permute.xlu1 %887 }
 0x431   : > { %v893_v45 = vsel %vm607_vm3, %v888_v44, %v891_v43 }
 0x432   : > { %v905_v46 = vmul.f32 %v893_v45, %v530_v42 }
 0x434   : > { %v699_v47 = vpop.permute.xlu0 %698  ;;  %907 = vrot.lane.b32.xlu1 %v905_v46, %s2028_s13  ;;  %v696_v48 = vpop.permute.xlu1 %695  ;;  %s2037_s13 = smov 104  }
 0x435   : > { %v702_v49 = vsel %vm701_vm4, %v696_v48, %v699_v47 }
 0x436   : > { %v711_v50 = vmul.f32 %v702_v49, %v529_v37 }
 0x438   : > { %v707_v52 = vpop.permute.xlu0 %706  ;;  %v704_v53 = vpop.permute.xlu1 %703  ;;  %v712_v55 = vadd.f32 %v711_v50, %v710_v51 }
 0x439   : > { %v709_v54 = vsel %vm607_vm3, %v704_v53, %v707_v52 }
 0x43a   : > { %v713_v56 = vmul.f32 %v709_v54, %v530_v42 }
 0x43c   : > { %v714_v57 = vadd.f32 %v713_v56, %v712_v55  ;;  %v896_v60 = vpop.permute.xlu1 %895 }
 0x43d   : > { %v898_v62 = vmul.f32 %v896_v60, %v878_v32 }
 0x43e   : > { %v911_v58 = vpack.c.bf16 %v714_v57, %v714_v57 }
 0x440   : > { %988 = vrot.lane.b32.xlu0 %v911_v58, %s2035_s29  ;;  %v921_v59 = vsel %vm916_vm5, %v911_v58, 0  ;;  %s2363_s29 = scalar_lea.hbm %s2416_s11, %s1530_s14 }
 0x441   : > { %1604 = vmatpush3.bf16.xpose.msra.mxu0 %v921_v59 }
 0x442   : > { %1615 = vmatprep.subr.bf16.mxu0 %v2025_v0 }
 0x444   : > { %1060 = vrot.lane.b32.xlu0 %v911_v58, %s2036_s15  ;;  %s1358_s15 = scalar_lea.sflag [#allocation4], %s453_s26 }
 0x448   : > { %1132 = vrot.lane.b32.xlu0 %v911_v58, %s2037_s13  ;;  %s2042_s13 = smov [#allocation13]  }
 0x4a2   : > { %v902_v61 = vpop.permute.xlu0 %901 }
 0x4a3   : > { %v904_v63 = vadd.f32 %v902_v61, %v898_v62 }
 0x4a6   : > { %v908_v1 = vpop.permute.xlu1 %907 }
 0x4a7   : > { %v910_v2 = vadd.f32 %v908_v1, %v904_v63 }
 0x4a9   : > { %v912_v3 = vpack.c.bf16 %v910_v2, %v910_v2 }
 0x4ab   : > { %1130 = vrot.lane.b32.xlu0 %v912_v3, %s2038_s22  ;;  %914 = vrot.lane.b32.xlu1 %v912_v3, %s2027_s24  ;;  %s2041_s24 = smov 64   ;;  %s1943_s22 = sshll.u32 %s2042_s13, 4  ;;  %s1944_s22 = int_to_ptr.vmem [resolvable:$false] %s1943_s22 }
 0x4ac   : > { %p1946_p7 = scmp.lt.s32.totalorder %s2365_s30, %s1944_s22 }
 0x4af   : > { %985 = vrot.lane.b32.xlu1 %v912_v3, %s2039_s19  ;;  %s1945_s19 = scalar_lea.vmem %s1944_s22, 256 }
 0x4b0   : > { %p1947_p5 = scmp.lt.s32.totalorder %s1945_s19, %s1939_s21 }
 0x4b2   : > { %v989_v4 = vpop.permute.xlu0 %988  ;;  %p1948_p13 = por %p1947_p5, %p1946_p7 }
 0x4b3   : > { %v994_v5 = vsel %vm916_vm5, %v989_v4, 0  ;;  %1058 = vrot.lane.b32.xlu1 %v912_v3, %s2040_s5 }
 0x4b4   : > { %1610 = vmatpush3.bf16.xpose.msra.mxu1 %v994_v5  ;;  %p1949_p6 = pnand %p1948_p13, %p1942_p4 }
 0x4b5   : > { %1621 = vmatprep.subr.bf16.mxu1 %v2025_v0 }
 0x4b6   : > { %v1061_v6 = vpop.permute.xlu0 %1060 }
 0x4b7   : > { %v1066_v8 = vsel %vm916_vm5, %v1061_v6, 0 }
 0x4ba   : > { %v1133_v10 = vpop.permute.xlu0 %1132 }
 0x4bb   : > { %v1138_v12 = vsel %vm916_vm5, %v1133_v10, 0 }
 0x51d   : > { %v915_v7 = vpop.permute.xlu1 %914  ;;  %v1131_v15 = vpop.permute.xlu0 %1130 }
 0x51e   : > { %1606 = vmatmul.mubr.msk.bf16.vlgmr.msra.gmra.mxu0 %vm916_vm5, %v915_v7 }
 0x51f   : > { %1616 = vmatpush3.bf16.xpose.msra.mxu0 %v1066_v8  ;;  %1617 = vmatprep.mubr.msk.bf16.mxu0 %vm2026_vm0, %v2025_v0 }
 0x520   : > { %1627 = vmatprep.subr.mxu0 %v2025_v0 }
 0x521   : > { %v986_v11 = vpop.permute.xlu1 %985 }
 0x522   : > { %1612 = vmatmul.mubr.msk.bf16.vlgmr.msra.gmra.mxu1 %vm916_vm5, %v986_v11 }
 0x523   : > { %1622 = vmatpush3.bf16.xpose.msra.mxu1 %v1138_v12  ;;  %1623 = vmatprep.mubr.msk.bf16.mxu1 %vm2026_vm0, %v2025_v0 }
 0x524   : > { %1632 = vmatprep.subr.bf16.mxu1 %v2025_v0 }
 0x525   : > { %v1059_v13 = vpop.permute.xlu1 %1058 }
 0x526   : > { %1618 = vmatmul.mubr.msk.bf16.vlgmr.msra.gmra.mxu0 %vm916_vm5, %v1059_v13 }
 0x527   : > { %1628 = vmatpush3.msk.msra.mxu0 %vm611_vm2, %v2287_v14  ;;  %1629 = vmatprep.mubr.msk.f32.mxu0 %vm2026_vm0, %v2025_v0 }
 0x52a   : > { %1624 = vmatmul.mubr.msk.bf16.vlgmr.msra.gmra.mxu1 %vm916_vm5, %v1131_v15 }
 0x52b   : > { %1636 = vmatprep.mubr.msk.bf16.mxu1 %vm2026_vm0, %v2025_v0 }
 0x5de   : > { %v957_v16 = vpop.f32.mrf.mxu0 }
 0x5df   : > { %v963_v17 = vsel %vm916_vm5, %v957_v16, -inf }
 0x5e0   : > { %v964_v18 = vrot.slane %v963_v17, 4  ;;  %v1607_v19 = vpop.f32.mrf.mxu0 }
 0x5e2   : > { %v965_v20 = vmax.f32 %v963_v17, %v964_v18  ;;  %v960_v21 = vpop.f32.mrf.mxu0  ;;  %v1030_v22 = vpop.f32.mrf.mxu1 }
 0x5e3   : > { %v1036_v23 = vsel %vm916_vm5, %v1030_v22, -inf }
 0x5e4   : > { %v966_v14 = vrot.slane %v965_v20, 2  ;;  %v1037_v24 = vrot.slane %v1036_v23, 4  ;;  %v1608_v25 = vpop.f32.mrf.mxu0  ;;  %v1613_v26 = vpop.f32.mrf.mxu1 }
 0x5e6   : > { %v967_v27 = vmax.f32 %v965_v20, %v966_v14  ;;  %v1038_v28 = vmax.f32 %v1036_v23, %v1037_v24  ;;  %v1033_v29 = vpop.f32.mrf.mxu1  ;;  %v1102_v30 = vpop.f32.mrf.mxu0 }
 0x5e7   : > { %v1108_v31 = vsel %vm916_vm5, %v1102_v30, -inf }
 0x5e8   : > { %v968_v32 = vrot.slane %v967_v27, 1  ;;  %v1039_v33 = vrot.slane %v1038_v28, 2  ;;  %v1109_v34 = vrot.slane %v1108_v31, 4  ;;  %v1614_v35 = vpop.f32.mrf.mxu1  ;;  %v1619_v36 = vpop.f32.mrf.mxu0 }
 0x5ea   : > { %v969_v37 = vmax.f32 %v967_v27, %v968_v32  ;;  %v1040_v38 = vmax.f32 %v1038_v28, %v1039_v33  ;;  %v1110_v39 = vmax.f32 %v1108_v31, %v1109_v34  ;;  %v1105_v40 = vpop.f32.mrf.mxu0  ;;  %v1174_v41 = vpop.f32.mrf.mxu1 }
 0x5eb   : > { %v1180_v42 = vsel %vm916_vm5, %v1174_v41, -inf }
 0x5ec   : > { %v970_v43 = vsub.f32 %v957_v16, %v969_v37  ;;  %v1041_v44 = vrot.slane %v1040_v38, 1  ;;  %v1111_v45 = vrot.slane %v1110_v39, 2  ;;  %v1181_v46 = vrot.slane %v1180_v42, 4  ;;  %v1620_v47 = vpop.f32.mrf.mxu0  ;;  %v1625_v48 = vpop.f32.mrf.mxu1 }
 0x5ee   : > { %v971_v49 = vmul.f32 1.442695, %v970_v43  ;;  %v1042_v50 = vmax.f32 %v1040_v38, %v1041_v44  ;;  %v1112_v51 = vmax.f32 %v1110_v39, %v1111_v45  ;;  %v1182_v52 = vmax.f32 %v1180_v42, %v1181_v46  ;;  %v1177_v53 = vpop.f32.mrf.mxu1 }
 0x5f0   : > { %1767 = vpow2.f32 %v971_v49  ;;  %v1043_v54 = vsub.f32 %v1030_v22, %v1042_v50  ;;  %v1113_v55 = vrot.slane %v1112_v51, 1  ;;  %v1183_v56 = vrot.slane %v1182_v52, 2  ;;  %v1626_v57 = vpop.f32.mrf.mxu1 }
 0x5f1   : > { %v1762_v57 = vld [vmem:[#allocation2] sm:$0xff]  }
 0x5f2   : > { %v1044_v58 = vmul.f32 1.442695, %v1043_v54  ;;  %v1114_v59 = vmax.f32 %v1112_v51, %v1113_v55  ;;  %v1184_v60 = vmax.f32 %v1182_v52, %v1183_v56  ;;  %v1761_v56 = vld [vmem:[#allocation2 + $0x8] sm:$0xff]  }
 0x5f3   : > { %1633 = vmatpush3.bf16.msra.mxu1 %v1761_v56 }
 0x5f4   : > { %1769 = vpow2.f32 %v1044_v58  ;;  %v1115_v61 = vsub.f32 %v1102_v30, %v1114_v59  ;;  %v1185_v62 = vrot.slane %v1184_v60, 1  ;;  %1634 = vmatprep.subr.bf16.mxu1 %v2025_v0 }
 0x5f6   : > { %v1116_v63 = vmul.f32 1.442695, %v1115_v61  ;;  %v1186_v1 = vmax.f32 %v1184_v60, %v1185_v62 }
 0x5f7   : > { %1635 = vmatpush3.bf16.msra.mxu1 %v1762_v57 }
 0x5f8   : > { %1771 = vpow2.f32 %v1116_v63  ;;  %v1187_v2 = vsub.f32 %v1174_v41, %v1186_v1  ;;  %v1525_v1 = vld [vmem:[#allocation5] ss:$0 sm:$0xff] }
 0x5fa   : > { %v1188_v3 = vmul.f32 1.442695, %v1187_v2 }
 0x5fc   : > { %1773 = vpow2.f32 %v1188_v3 }
 0x5fd   : > { %v1768_v4 = vpop.eup %1767 }
 0x5fe   : > { %v973_v5 = vsel %vm916_vm5, %v1768_v4, 0.0 }
 0x5ff   : > { %v974_v6 = vrot.slane %v973_v5, 4 }
 0x601   : > { %v1770_v7 = vpop.eup %1769  ;;  %v975_v8 = vadd.f32 %v974_v6, %v973_v5 }
 0x602   : > { %v1046_v10 = vsel %vm916_vm5, %v1770_v7, 0.0 }
 0x603   : > { %v976_v11 = vrot.slane %v975_v8, 2  ;;  %v1047_v12 = vrot.slane %v1046_v10, 4 }
 0x605   : > { %v1772_v13 = vpop.eup %1771  ;;  %v1048_v15 = vadd.f32 %v1047_v12, %v1046_v10  ;;  %v977_v16 = vadd.f32 %v976_v11, %v975_v8 }
 0x606   : > { %v1118_v17 = vsel %vm916_vm5, %v1772_v13, 0.0 }
 0x607   : > { %v1049_v18 = vrot.slane %v1048_v15, 2  ;;  %v1119_v19 = vrot.slane %v1118_v17, 4  ;;  %v978_v20 = vrot.slane %v977_v16, 1 }
 0x609   : > { %v1774_v21 = vpop.eup %1773  ;;  %v1120_v22 = vadd.f32 %v1119_v19, %v1118_v17  ;;  %v979_v23 = vadd.f32 %v978_v20, %v977_v16  ;;  %v1050_v14 = vadd.f32 %v1049_v18, %v1048_v15 }
 0x60a   : > { %v1190_v24 = vsel %vm916_vm5, %v1774_v21, 0.0 }
 0x60b   : > { %v1121_v25 = vrot.slane %v1120_v22, 2  ;;  %v1191_v26 = vrot.slane %v1190_v24, 4  ;;  %1775 = vrcp.f32 %v979_v23  ;;  %v1051_v27 = vrot.slane %v1050_v14, 1 }
 0x60d   : > { %v1192_v28 = vadd.f32 %v1191_v26, %v1190_v24  ;;  %v1052_v29 = vadd.f32 %v1051_v27, %v1050_v14  ;;  %v1122_v30 = vadd.f32 %v1121_v25, %v1120_v22 }
 0x60f   : > { %v1193_v31 = vrot.slane %v1192_v28, 2  ;;  %1777 = vrcp.f32 %v1052_v29  ;;  %v1123_v32 = vrot.slane %v1122_v30, 1 }
 0x611   : > { %v1124_v33 = vadd.f32 %v1123_v32, %v1122_v30  ;;  %v1194_v34 = vadd.f32 %v1193_v31, %v1192_v28 }
 0x613   : > { %1779 = vrcp.f32 %v1124_v33  ;;  %v1195_v35 = vrot.slane %v1194_v34, 1 }
 0x615   : > { %v1196_v36 = vadd.f32 %v1195_v35, %v1194_v34 }
 0x617   : > { %1781 = vrcp.f32 %v1196_v36 }
 0x618   : > { %v1776_v37 = vpop.eup %1775 }
 0x619   : > { %v981_v38 = vmul.f32 %v1776_v37, %v1768_v4 }
 0x61b   : > { %v982_v39 = vsel %vm916_vm5, %v981_v38, 0.0 }
 0x61c   : > { %v1778_v40 = vpop.eup %1777  ;;  %983 = vadd.xlane.f32.xlu1 %v982_v39 }
 0x61d   : > { %v1054_v41 = vmul.f32 %v1778_v40, %v1770_v7 }
 0x61f   : > { %v1055_v42 = vsel %vm916_vm5, %v1054_v41, 0.0 }
 0x620   : > { %v1780_v43 = vpop.eup %1779  ;;  %1056 = vadd.xlane.f32.xlu0 %v1055_v42 }
 0x621   : > { %v1126_v44 = vmul.f32 %v1780_v43, %v1772_v13 }
 0x623   : > { %v1127_v45 = vsel %vm916_vm5, %v1126_v44, 0.0 }
 0x624   : > { %v1782_v46 = vpop.eup %1781  ;;  %1128 = vadd.xlane.f32.xlu0 %v1127_v45 }
 0x625   : > { %v1198_v47 = vmul.f32 %v1782_v46, %v1774_v21 }
 0x627   : > { %v1199_v48 = vsel %vm916_vm5, %v1198_v47, 0.0 }
 0x628   : > { %1200 = vadd.xlane.f32.xlu1 %v1199_v48 }
 0x6a5   : > { %v984_v50 = vpop.xlane.xlu1 %983 }
 0x6a9   : > { %v1057_v49 = vpop.xlane.xlu0 %1056 }
 0x6aa   : > { %v1203_v52 = vsel %vm1202_vm6, %v984_v50, %v1057_v49 }
 0x6ad   : > { %v1129_v51 = vpop.xlane.xlu0 %1128 }
 0x6ae   : > { %v1205_v53 = vsel %vm1204_vm7, %v1203_v52, %v1129_v51 }
 0x6b1   : > { %v1201_v54 = vpop.xlane.xlu1 %1200 }
 0x6b2   : > { %v1207_v55 = vsel %vm1206_vm8, %v1205_v53, %v1201_v54 }
 0x6b3   : > { %1630 = vmatmul.mubr.msk.f32.vlgmr.msra.gmra.mxu0 %vm607_vm3, %v1207_v55 }
 0x773   : > { %v1277_v58 = vpop.f32.mrf.mxu0 }
 0x774   : > { %1282 = vrot.lane.b32.xlu0 %v1277_v58, %s2041_s24 }
 0x775   : > { %v1631_v59 = vpop.f32.mrf.mxu0 }
 0x7e6   : > { %v1283_v60 = vpop.permute.xlu0 %1282 }
 0x7e7   : > { %v1285_v61 = vmul.f32 %v1283_v60, %v2279_v9 }
 0x7e9   : > { %v1286_v62 = vpack.c.bf16 %v1285_v61, %v1285_v61 }
 0x7eb   : > { %1299 = vrot.lane.b32.xlu1 %v1286_v62, %s2041_s24 }
 0x85d   : > { %v1300_v63 = vpop.permute.xlu1 %1299 }
 0x85e   : > { %1637 = vmatmul.mubr.msk.bf16.vlgmr.msra.gmra.mxu1 %vm479_vm1, %v1300_v63 }
 0x91e   : > { %v1350_v0 = vpop.f32.mrf.mxu1 }
 0x91f   : > { %v1351_v2 = vadd.f32 %v1525_v1, %v1350_v0 }
 0x920   : > { %v1638_v9 = vpop.f32.mrf.mxu1 }
 0x921   : > { %1356 = vst.msk [vmem:[%s455_s25] sm:$0xff] %vm479_vm1, %v1351_v2 }
 0x922   : > { %v1353_v3 = vpop.f32.mrf.mxu1 }
 0x923   : > { %1952 = shalt.err (!%p1949_p6)
}
 0x924   : > { %s1953_s5 = scalar_lea.hbm %s2363_s29, 128  ;;  %s1957_s16 = scalar_lea.hbm %s2416_s11, 256 }
 0x925   : > { %p1954_p10 = scmp.ne.s32.totalorder %s2363_s29, %s1953_s5  ;;  %p1958_p11 = scmp.lt.s32.totalorder %s2363_s29, %s2416_s11 }
 0x926   : > { %p1959_p0 = scmp.lt.s32.totalorder %s1957_s16, %s1953_s5 }
 0x927   : > { %p1955_p8 = pnand %p1954_p10, %p2441_p9 }
 0x928   : > { %p1960_p1 = por %p1959_p0, %p1958_p11 }
 0x929   : > { %p1956_p12 = pneg %p1955_p8 }
 0x92b   : > { %p1961_p2 = pnand %p1960_p1, %p1956_p12 }
 0x92d   : > { %1964 = shalt.err (!%p1961_p2)
}
 0x92e   : > { %1664 = dma.vmem_to_hbm [thread:$0]  (%p2441_p9), %s2365_s30, 128, %s2363_s29, %s1358_s15   ;;  %v1639_v4 = vpop.f32.mrf.mxu1 }
 0x92f PF: > { %p1701_p3 = scmp.ge.s32.totalorder %s2015_s20, 2  ;;  %s1383_s12 = sand.u32 1, %s2003_s17  }
 0x930   : > { %p2442_p4 = scmp.ne.s32.totalorder %s2426_s28, 0  ;;  %s1384_s3 = scalar_lea.sflag [#allocation4], %s1383_s12 }
 0x932   : > { %p1686_p7 = pnand %p1701_p3, %p2442_p4 }
 0x934   : > { %p1687_p5 = pneg %p1686_p7 }
 0x936   : > { %1998 = dma.done.wait (%p1687_p5), %s1384_s3, 128  }
 0x937   : > { %2000 = vsyncadd (%p1687_p5), %s1384_s3, 4294967168  ;;  %s2443_s21 = sld [smem:[#allocation19_spill]]  ;;  %p25_p13 = scmp.ge.s32.totalorder %s2128_s23, 4  }
 0x938   : > { %s2444_s19 = sld [smem:[#allocation20_spill]]  ;;  %s2445_s17 = smov %s2007_s18 }
 0x939   : > { %s2447_s20 = smov %s2128_s23  ;;  %27 = sbr.rel (!%p25_p13) target bundleno = 10 (0xa), region = 124 }
 0x93d   : > { %s2446_s18 = smov %s2443_s21 }
 0x93e   :  { %1389 = vsyncpa [#allocation3], 1 }
 0x93f   :  { %1391 = vsyncpa [#allocation3 + $0x1], 1 }
 0x940   :  { %1392 = vsyncpa [#allocation6], 1 }
 0x941   :  { %1393 = vsyncpa [#allocation9], 1 }
 0x942   :  { %1394 = vsyncpa [#allocation12], 1 }
 0x943   :  { %1395 = vsyncpa [#allocation4], 1 }
 0x944   :  { %1397 = vsyncpa [#allocation4 + $0x1], 1 }

// kernel: tpu_custom_call.1
= control target key start
LH: loop header
LB: loop body
LE: loop exit
PB: predicated region body
PF: predicated region fallthrough
CT: control target
= control target key end

     0   :  { %s2405_s0 = inlined_call_operand.vmem [shape: f32[2,8,32], index: 0, kind: input, shape index: {}]   ;;  %s2406_s1 = inlined_call_operand.vmem [shape: bf16[32,96], index: 1, kind: input, shape index: {}]   ;;  %s2407_s2 = inlined_call_operand.hbm [shape: bf16[32,32], index: 2, kind: input, shape index: {}]   ;;  %s2408_s3 = inlined_call_operand.hbm [shape: f32[1,32], index: 3, kind: input, shape index: {}]   ;;  %s2409_s4 = inlined_call_operand.hbm [shape: f32[1,32], index: 4, kind: input, shape index: {}]   ;;  %s2410_s5 = inlined_call_operand.hbm [shape: f32[1,32], index: 5, kind: input, shape index: {}]   ;;  %s2411_s6 = inlined_call_operand.vmem [shape: f32[8,32], index: 6, kind: input, shape index: {}]   ;;  %s2412_s7 = inlined_call_operand.vmem [shape: f32[8,32], index: 7, kind: input, shape index: {}]   ;;  %s2413_s8 = inlined_call_operand.hbm [shape: f32[8,32], index: 8, kind: input, shape index: {}]   ;;  %s2414_s9 = inlined_call_operand.vmem [shape: f32[32,4], index: 9, kind: input, shape index: {}]   ;;  %s2415_s10 = inlined_call_operand.hbm [shape: f32[4,32], index: 10, kind: input, shape index: {}]   ;;  %s2416_s11 = inlined_call_operand.hbm [shape: f32[2,8,32], index: 11, kind: output, shape index: {}]  }
   0x1   :  { %2421 = sst [smem:[#allocation21_spill]] %s2408_s3 }
   0x2   :  { %2422 = sst [smem:[#allocation22_spill]] %s2410_s5 }
   0x3   :  { %16 = vsyncpa [#allocation3], 0 }
   0x4   :  { %17 = vsyncpa [#allocation6], 0 }
   0x5   :  { %18 = vsyncpa [#allocation9], 0 }
   0x6   :  { %19 = vsyncpa [#allocation12], 0 }
   0x7   :  { %20 = vsyncpa [#allocation4], 0 }
   0x8   :  { %22 = vsyncpa [#allocation4 + $0x1], 0  ;;  %s2103_s17 = smov 0   ;;  %s2105_s18 = smov 0  }
   0x9   :  { %s2107_s19 = smov 0   ;;  %s2109_s20 = smov 0  }
   0xa LB: > { %2423 = sst [smem:[#allocation19_spill]] %s2011_s19  ;;  %s2124_s21 = sadd.s32 4294967295, %s2015_s20   ;;  %s2015_s20 = sphi %s2109_s20, %s2447_s20   ;;  %s2011_s19 = sphi %s2107_s19, %s2444_s19   ;;  %s2007_s18 = sphi %s2105_s18, %s2446_s18   ;;  %s2003_s17 = sphi %s2103_s17, %s2445_s17  }
   0xb   : > { %s1490_s22 = sadd.s32 4294967294, %s2015_s20   ;;  %s2128_s23 = sadd.s32 1, %s2015_s20  }
   0xc   : > { %s271_s24 = sadd.s32 1, %s2011_s19  ;;  %s268_s25 = ssub.s32 %s2015_s20, %s2128_s23 }
   0xd   : > { %p281_p0 = scmp.ne.s32.totalorder %s2011_s19, %s2007_s18  ;;  %p269_p1 = scmp.eq.s32.totalorder %s268_s25, 0 }
   0xe   : > { %p282_p2 = scmp.eq.s32.totalorder %s2124_s21, 1  ;;  %p287_p3 = scmp.ne.s32.totalorder %s2007_s18, %s2003_s17 }
   0xf   : > { %p288_p4 = scmp.eq.s32.totalorder %s1490_s22, 1  ;;  %p1491_p7 = scmp.ge.s32.totalorder %s2015_s20, 1 }
  0x10   : > { %s2139_s26 = scalar_select %p269_p1, %s2011_s19, %s271_s24  }
  0x11   : > { %p2141_p5 = por %p282_p2, %p281_p0  ;;  %p2145_p6 = por %p288_p4, %p287_p3 }
  0x12   : > { %2424 = sst [smem:[#allocation20_spill]] %s2139_s26  ;;  %p295_p8 = scmp.lt.s32.totalorder %s2015_s20, 3 }
  0x13   : > { %s2425_s27 = scalar_select %p2141_p5, 1, 0 }
  0x14   : > { %s2426_s28 = scalar_select %p2145_p6, 1, 0 }
  0x15   : > { %p2417_p9 = scmp.eq.s32.totalorder %s2124_s21, 0  ;;  %p2152_p10 = pnand %p1491_p7, %p295_p8 }
  0x16   : > { %s2017_s30 = smov [#allocation5]   ;;  %s2018_s13 = smov [#allocation8]  }
  0x17   : > { %s2427_s29 = scalar_select %p2152_p10, 1, 0 }
  0x18   : > { %s324_s12 = sshll.u32 %s2017_s30, 4  ;;  %p1666_p11 = pneg %p2152_p10  ;;  %s325_s12 = int_to_ptr.vmem [resolvable:$true] %s324_s12 }
  0x19   : > { %s346_s14 = sshll.u32 %s2018_s13, 4  ;;  %s2019_s16 = smov [#allocation2]   ;;  %s347_s14 = int_to_ptr.vmem [resolvable:$true] %s346_s14 }
  0x1a   : > { %p2160_p12 = pnand %p2417_p9, %p1666_p11  ;;  %s310_s22 = sshll.u32 %s2019_s16, 4  ;;  %s2164_s22 = int_to_ptr.vmem [resolvable:$true] %s310_s22 }
  0x1b   : > { %s1794_s25 = scalar_lea.vmem %s325_s12, 16  ;;  %s1801_s30 = scalar_lea.vmem %s325_s12, 32 }
  0x1c   : > { %p2168_p13 = pneg %p2160_p12  ;;  %p1795_p0 = scmp.ne.s32.totalorder %s325_s12, %s1794_s25 }
  0x1d   : > { %p1802_p3 = scmp.lt.s32.totalorder %s325_s12, %s325_s12  ;;  %p1803_p4 = scmp.lt.s32.totalorder %s1801_s30, %s1794_s25 }
  0x1e   : > { %p1797_p1 = pnand %p1795_p0, %p2168_p13 }
  0x1f   : > { %p1804_p7 = por %p1803_p4, %p1802_p3 }
  0x20   : > { %p1798_p2 = pneg %p1797_p1 }
  0x22   : > { %p1805_p8 = pnand %p1804_p7, %p1798_p2 }
  0x24   : > { %1808 = shalt.err (!%p1805_p8)
}
  0x25   : > { %s2430_s3 = sld [smem:[#allocation21_spill]]  ;;  %s1820_s26 = scalar_lea.vmem %s347_s14, 16 }
  0x26   : > { %p1821_p11 = scmp.ne.s32.totalorder %s347_s14, %s1820_s26  ;;  %s1827_s19 = scalar_lea.vmem %s347_s14, 32 }
  0x27   : > { %p1828_p0 = scmp.lt.s32.totalorder %s347_s14, %s347_s14  ;;  %p1829_p1 = scmp.lt.s32.totalorder %s1827_s19, %s1820_s26 }
  0x28   : > { %p1823_p9 = pnand %p1821_p11, %p2168_p13 }
  0x29   : > { %p1830_p5 = por %p1829_p1, %p1828_p0 }
  0x2a   : > { %p1824_p6 = pneg %p1823_p9 }
  0x2b   : > { %1672 = dma.hbm_to_vmem [thread:$0]  (!%p2160_p12), %s2430_s3, 16, %s325_s12, [#allocation6]  }
  0x2c   : > { %p1831_p10 = pnand %p1830_p5, %p1824_p6 }
  0x2e   : > { %1834 = shalt.err (!%p1831_p10)
}
  0x2f   : > { %s2431_s5 = sld [smem:[#allocation22_spill]]  ;;  %s1846_s12 = scalar_lea.vmem %s2164_s22, 256 }
  0x30   : > { %p1847_p2 = scmp.ne.s32.totalorder %s2164_s22, %s1846_s12  ;;  %p1854_p4 = scmp.lt.s32.totalorder %s2164_s22, %s2164_s22 }
  0x31   : > { %p1855_p7 = scmp.lt.s32.totalorder %s1846_s12, %s1846_s12 }
  0x32   : > { %p1849_p9 = pnand %p1847_p2, %p2168_p13 }
  0x33   : > { %p1856_p5 = por %p1855_p7, %p1854_p4 }
  0x34   : > { %p1850_p3 = pneg %p1849_p9 }
  0x35   : > { %1678 = dma.hbm_to_vmem [thread:$0]  (!%p2160_p12), %s2431_s5, 16, %s347_s14, [#allocation9]  }
  0x36   : > { %p1857_p6 = pnand %p1856_p5, %p1850_p3 }
  0x38   : > { %1860 = shalt.err (!%p1857_p6)
}
  0x39   : > { %s2020_s19 = smov 64   ;;  %s2021_s26 = smov 4  }
  0x3a   : > { %1669 = dma.hbm_to_vmem [thread:$0]  (!%p2160_p12), %s2407_s2, 256, %s2164_s22, [#allocation3], %s2020_s19, %s2020_s19, %s2021_s26  }
  0x3b   : > { %s2022_s14 = smov [#allocation7]   ;;  %s2023_s30 = smov [#allocation10]  }
  0x3c   : > { %s335_s25 = sshll.u32 %s2022_s14, 4  ;;  %s363_s3 = sshll.u32 %s2023_s30, 4  ;;  %s336_s25 = int_to_ptr.vmem [resolvable:$true] %s335_s25  ;;  %s364_s3 = int_to_ptr.vmem [resolvable:$true] %s363_s3 }
  0x3d   : > { %s1872_s5 = scalar_lea.vmem %s336_s25, 16  ;;  %s1879_s12 = scalar_lea.vmem %s336_s25, 32 }
  0x3e   : > { %p1873_p10 = scmp.ne.s32.totalorder %s336_s25, %s1872_s5  ;;  %p1880_p0 = scmp.lt.s32.totalorder %s336_s25, %s336_s25 }
  0x3f   : > { %p1881_p1 = scmp.lt.s32.totalorder %s1879_s12, %s1872_s5 }
  0x40   : > { %p1875_p8 = pnand %p1873_p10, %p2168_p13 }
  0x41   : > { %p1882_p2 = por %p1881_p1, %p1880_p0 }
  0x42   : > { %p1876_p11 = pneg %p1875_p8 }
  0x44   : > { %p1883_p9 = pnand %p1882_p2, %p1876_p11 }
  0x46   : > { %1886 = shalt.err (!%p1883_p9)
}
  0x47   : > { %1675 = dma.hbm_to_vmem [thread:$0]  (!%p2160_p12), %s2409_s4, 16, %s336_s25, [#allocation6]  }
  0x48   : > { %s1898_s19 = scalar_lea.vmem %s364_s3, 128  ;;  %p1906_p5 = scmp.lt.s32.totalorder %s364_s3, %s364_s3 }
  0x49   : > { %p1899_p3 = scmp.ne.s32.totalorder %s364_s3, %s1898_s19  ;;  %p1907_p6 = scmp.lt.s32.totalorder %s1898_s19, %s1898_s19 }
  0x4b   : > { %p1901_p4 = pnand %p1899_p3, %p2168_p13  ;;  %p1908_p10 = por %p1907_p6, %p1906_p5 }
  0x4d   : > { %p1902_p7 = pneg %p1901_p4 }
  0x4f   : > { %p1909_p8 = pnand %p1908_p10, %p1902_p7 }
  0x51   : > { %1912 = shalt.err (!%p1909_p8)
}
  0x52   : > { %1681 = dma.hbm_to_vmem [thread:$0]  (!%p2160_p12), %s2413_s8, 128, %s364_s3, [#allocation9]  }
  0x53   : > { %s2024_s16 = smov [#allocation11]  }
  0x54   : > { %s377_s14 = sshll.u32 %s2024_s16, 4  ;;  %s378_s14 = int_to_ptr.vmem [resolvable:$true] %s377_s14 }
  0x55   : > { %s1924_s25 = scalar_lea.vmem %s378_s14, 64  ;;  %p1932_p2 = scmp.lt.s32.totalorder %s378_s14, %s378_s14 }
  0x56   : > { %p1925_p11 = scmp.ne.s32.totalorder %s378_s14, %s1924_s25  ;;  %p1933_p9 = scmp.lt.s32.totalorder %s1924_s25, %s1924_s25 }
  0x58   : > { %p1927_p0 = pnand %p1925_p11, %p2168_p13  ;;  %p1934_p3 = por %p1933_p9, %p1932_p2 }
  0x5a   : > { %p1928_p1 = pneg %p1927_p0 }
  0x5c   : > { %p1935_p4 = pnand %p1934_p3, %p1928_p1 }
  0x5e   : > { %1938 = shalt.err (!%p1935_p4)
}
  0x5f   : > { %1684 = dma.hbm_to_vmem [thread:$0]  (!%p2160_p12), %s2415_s10, 64, %s378_s14, [#allocation12]  }
  0x60   : > { %p2432_p7 = scmp.ne.s32.totalorder %s2427_s29, 0 }
  0x61   : > { %p2433_p5 = scmp.eq.s32.totalorder (!%p2432_p7), %s2124_s21, 0 }
  0x62   : > { %397 = sbr.rel (%p2432_p7) target bundleno = 2351 (0x92f), region = 64 }
  0x67   : > { %1982 = dma.done.wait (%p2433_p5), [#allocation3], 256   ;;  %p2434_p13 = pmov %p2433_p5 }
  0x68   : > { %p2435_p6 = pmov %p2433_p5 }
  0x69   : > { %1984 = vsyncadd (%p2434_p13), [#allocation3], 4294967040 }
  0x6a   : > { %1986 = dma.done.wait (%p2435_p6), [#allocation6], 32   ;;  %p2436_p10 = pmov %p2433_p5 }
  0x6b   : > { %p2437_p8 = pmov %p2433_p5 }
  0x6c   : > { %1988 = vsyncadd (%p2436_p10), [#allocation6], 4294967264 }
  0x6d   : > { %1990 = dma.done.wait (%p2437_p8), [#allocation9], 144   ;;  %p2438_p12 = pmov %p2433_p5 }
  0x6e   : > { %p2439_p11 = pmov %p2433_p5 }
  0x6f   : > { %1992 = vsyncadd (%p2438_p12), [#allocation9], 4294967152 }
  0x70   : > { %1994 = dma.done.wait (%p2439_p11), [#allocation12], 64   ;;  %p2440_p0 = pmov %p2433_p5 }
  0x71   : > { %p456_p1 = scmp.lt.s32.totalorder %s2124_s21, 1  ;;  %v2025_v0 = vmov 0.0   ;;  %vm2026_vm0 = vmmov 0   ;;  %v1759_v1 = vld [vmem:[%s2406_s1 + $0x8] sm:$0xff]   ;;  %v1760_v2 = vld [vmem:[%s2406_s1] sm:$0xff]   ;;  %v526_v4 = vld [vmem:[%s2414_s9 + $0x18] sm:$0xff] }
  0x72   : > { %1996 = vsyncadd (%p2440_p0), [#allocation12], 4294967232  ;;  %1563 = vmatprep.subr.bf16.mxu0 %v2025_v0  ;;  %1567 = vmatprep.mubr.msk.bf16.mxu0 %vm2026_vm0, %v2025_v0  ;;  %v525_v5 = vld [vmem:[%s2414_s9 + $0x10] sm:$0xff]  ;;  %vm479_vm1 = vcmask 261120   ;;  %v524_v7 = vld [vmem:[%s2414_s9 + $0x8] sm:$0xff]  ;;  %s2027_s24 = smov 96  }
  0x73   : > { %s457_s3 = scalar_select %p456_p1, %s2124_s21, 1  ;;  %1571 = vmatprep.subr.mxu1 %v2025_v0  ;;  %1579 = vmatprep.mubr.msk.f32.mxu1 %vm2026_vm0, %v2025_v0  ;;  %v523_v8 = vld [vmem:[%s2414_s9] sm:$0xff]  ;;  %vm611_vm2 = vcmask 1043456   ;;  %vm607_vm3 = vcmask 31744   ;;  %v1518_v24 = vld [vmem:[#allocation8] ss:$0 sm:$0xff] }
  0x74   : > { %1564 = vmatpush3.bf16.msra.mxu0 %v1759_v1  ;;  %1572 = vmatpush3.msra.mxu1 %v526_v4  ;;  %v2287_v14 = vld [vmem:[#allocation11] sm:$0xf]  ;;  %s2029_s22 = smov 124   ;;  %s2030_s19 = smov 92   ;;  %v1514_v34 = vld [vmem:[#allocation7] ss:$0 sm:$0xff] }
  0x75   : > { %s1507_s29 = sshll.u32 %s457_s3, 3  ;;  %1565 = vmatprep.subr.bf16.mxu0 %v2025_v0  ;;  %1573 = vmatprep.subr.mxu1 %v2025_v0  ;;  %s2031_s5 = smov 100   ;;  %v528_v36 = vld [vmem:[%s2411_s6] sm:$0xff]  ;;  %vm701_vm4 = vcmask 228352   ;;  %v530_v42 = vld [vmem:[#allocation10] sm:$0xff]  ;;  %vm916_vm5 = vcmask 64512  }
  0x76   : > { %s459_s13 = scalar_lea.vmem %s2405_s0, %s1507_s29  ;;  %1574 = vmatpush3.msra.mxu1 %v525_v5  ;;  %s2032_s26 = smov 68   ;;  %v529_v37 = vld [vmem:[%s2412_s7] sm:$0xff]  ;;  %vm1202_vm6 = vcmask 7168   ;;  %vm1204_vm7 = vcmask 15360   ;;  %vm1206_vm8 = vcmask 23552  }
  0x77   : > { %v461_v3 = vld [vmem:[%s459_s13] sm:$0xff]  ;;  %1575 = vmatprep.subr.mxu1 %v2025_v0  ;;  %s2028_s13 = smov 32   ;;  %s2033_s16 = smov 28  }
  0x78   : > { %v462_v6 = vpack.c.bf16 %v461_v3, %v461_v3  ;;  %1566 = vmatpush3.bf16.msra.mxu0 %v1760_v2  ;;  %1576 = vmatpush3.msra.mxu1 %v524_v7  ;;  %s2034_s14 = smov 4   ;;  %s2035_s29 = smov 120  }
  0x79   : > { %1587 = vmatprep.subr.mxu0 %v2025_v0  ;;  %1577 = vmatprep.subr.mxu1 %v2025_v0  ;;  %s2036_s15 = smov 112   ;;  %p2441_p9 = scmp.ne.s32.totalorder %s2425_s27, 0 }
  0x7a   : > { %1578 = vmatpush3.msra.mxu1 %v523_v8  ;;  %875 = vrot.lane.b32.xlu1 %v1518_v24, %s2028_s13 }
  0x7b   : > { %1568 = vmatmul.mubr.msk.bf16.vlgmr.msra.gmra.mxu0 %vm479_vm1, %v462_v6  ;;  %1582 = vmatprep.subr.mxu1 %v2025_v0 }
  0x7c   : > { %1588 = vmatpush3.msra.mxu0 %v526_v4  ;;  %1595 = vmatprep.mubr.msk.f32.mxu0 %vm2026_vm0, %v2025_v0 }
  0x7d   : > { %1589 = vmatprep.subr.mxu0 %v2025_v0 }
  0x7e   : > { %1590 = vmatpush3.msra.mxu0 %v525_v5 }
  0x7f   : > { %1591 = vmatprep.subr.mxu0 %v2025_v0 }
  0x80   : > { %1592 = vmatpush3.msra.mxu0 %v524_v7 }
  0x81   : > { %1593 = vmatprep.subr.mxu0 %v2025_v0 }
  0x82   : > { %1594 = vmatpush3.msra.mxu0 %v523_v8 }
  0x83   : > { %1603 = vmatprep.subr.bf16.mxu0 %v2025_v0 }
  0xec   : > { %v876_v30 = vpop.permute.xlu1 %875 }
 0x13b   : > { %v2279_v9 = vpop.f32.mrf.mxu0 }
 0x13c   : > { %v531_v10 = vmul.f32 %v2279_v9, %v2279_v9 }
 0x13d   : > { %v1569_v11 = vpop.f32.mrf.mxu0 }
 0x13e   : > { %715 = vrot.lane.b32.xlu0 %v531_v10, %s2027_s24  ;;  %1580 = vmatmul.mubr.msk.f32.vlgmr.msra.gmra.mxu1 %vm479_vm1, %v531_v10 }
 0x13f   : > { %v520_v12 = vpop.f32.mrf.mxu0  ;;  %1584 = vmatprep.mubr.msk.f32.mxu1 %vm2026_vm0, %v2025_v0  ;;  %1583 = vmatpush3.msk.msra.mxu1 %vm611_vm2, %v2287_v14 }
 0x140   : > { %1598 = vmatprep.subr.mxu1 %v2025_v0 }
 0x141   : > { %v1570_v13 = vpop.f32.mrf.mxu0 }
 0x1b0   : > { %v716_v15 = vpop.permute.xlu0 %715 }
 0x1b1   : > { %1596 = vmatmul.mubr.msk.f32.vlgmr.msra.gmra.mxu0 %vm479_vm1, %v716_v15 }
 0x1b2   : > { %1605 = vmatprep.mubr.msk.bf16.mxu0 %vm2026_vm0, %v2025_v0 }
 0x1fe   : > { %v601_v16 = vpop.f32.mrf.mxu1 }
 0x1ff   : > { %v605_v17 = vmax.f32 %v601_v16, 1e-24 }
 0x200   : > { %v1581_v18 = vpop.f32.mrf.mxu1 }
 0x201   : > { %1763 = vrsqrt.f32 %v605_v17 }
 0x20e   : > { %v1764_v19 = vpop.eup %1763 }
 0x20f   : > { %1585 = vmatmul.mubr.msk.f32.vlgmr.msra.gmra.mxu1 %vm607_vm3, %v1764_v19 }
 0x210   : > { %1599 = vmatpush3.msk.msra.mxu1 %vm611_vm2, %v2287_v14  ;;  %1600 = vmatprep.mubr.msk.f32.mxu1 %vm2026_vm0, %v2025_v0 }
 0x211   : > { %1609 = vmatprep.subr.bf16.mxu1 %v2025_v0 }
 0x271   : > { %v785_v20 = vpop.f32.mrf.mxu0 }
 0x272   : > { %v789_v21 = vmax.f32 %v785_v20, 1e-24 }
 0x273   : > { %v1597_v22 = vpop.f32.mrf.mxu0 }
 0x274   : > { %1765 = vrsqrt.f32 %v789_v21 }
 0x281   : > { %v1766_v23 = vpop.eup %1765 }
 0x282   : > { %1601 = vmatmul.mubr.msk.f32.vlgmr.msra.gmra.mxu1 %vm607_vm3, %v1766_v23 }
 0x283   : > { %1611 = vmatprep.mubr.msk.bf16.mxu1 %vm2026_vm0, %v2025_v0 }
 0x2cf   : > { %v681_v25 = vpop.f32.mrf.mxu1 }
 0x2d0   : > { %v685_v33 = vmul.f32 %v681_v25, %v2279_v9 }
 0x2d1   : > { %v1586_v26 = vpop.f32.mrf.mxu1 }
 0x2d2   : > { %v693_v35 = vmul.f32 %v1514_v34, %v685_v33 }
 0x2d4   : > { %v710_v51 = vmul.f32 %v693_v35, %v528_v36 }
 0x342   : > { %v860_v27 = vpop.f32.mrf.mxu1 }
 0x343   : > { %865 = vrot.lane.b32.xlu0 %v860_v27, %s2028_s13 }
 0x344   : > { %v1602_v28 = vpop.f32.mrf.mxu1 }
 0x3b5   : > { %v866_v29 = vpop.permute.xlu0 %865 }
 0x3b6   : > { %v868_v31 = vmul.f32 %v866_v29, %v2279_v9 }
 0x3b8   : > { %v878_v32 = vmul.f32 %v876_v30, %v868_v31 }
 0x3ba   : > { %883 = vrot.lane.b32.xlu0 %v878_v32, %s2029_s22  ;;  %880 = vrot.lane.b32.xlu1 %v878_v32, %s2030_s19  ;;  %s2039_s19 = smov 88  }
 0x3be   : > { %890 = vrot.lane.b32.xlu0 %v878_v32, %s2031_s5  ;;  %887 = vrot.lane.b32.xlu1 %v878_v32, %s2032_s26  ;;  %s453_s26 = sand.u32 1, %s2007_s18  }
 0x3c2   : > { %698 = vrot.lane.b32.xlu0 %v693_v35, %s2033_s16  ;;  %695 = vrot.lane.b32.xlu1 %v693_v35, %s2029_s22  ;;  %s2038_s22 = smov 72   ;;  %s1506_s16 = sshll.u32 %s453_s26, 3 }
 0x3c3   : > { %s455_s25 = scalar_lea.vmem [#allocation13], %s1506_s16 }
 0x3c4   : > { %s1371_s30 = sshll.u32 %s455_s25, 4  ;;  %s2365_s30 = int_to_ptr.vmem [resolvable:$true] %s1371_s30 }
 0x3c6   : > { %706 = vrot.lane.b32.xlu0 %v693_v35, %s2034_s14  ;;  %703 = vrot.lane.b32.xlu1 %v693_v35, %s2031_s5  ;;  %s2040_s5 = smov 80   ;;  %s1530_s14 = sshll.u32 %s2124_s21, 7 }
 0x3c7   : > { %s1939_s21 = scalar_lea.vmem %s2365_s30, 128 }
 0x3c8   : > { %p1940_p2 = scmp.ne.s32.totalorder %s2365_s30, %s1939_s21 }
 0x3ca   : > { %895 = vrot.lane.b32.xlu1 %v528_v36, %s2028_s13  ;;  %p1941_p3 = pnand %p1940_p2, %p2441_p9 }
 0x3cc   : > { %p1942_p4 = pneg %p1941_p3 }
 0x42c   : > { %v884_v38 = vpop.permute.xlu0 %883  ;;  %v881_v39 = vpop.permute.xlu1 %880 }
 0x42d   : > { %v886_v40 = vsel %vm701_vm4, %v881_v39, %v884_v38 }
 0x42e   : > { %v899_v41 = vmul.f32 %v886_v40, %v529_v37 }
 0x430   : > { %v891_v43 = vpop.permute.xlu0 %890  ;;  %901 = vrot.lane.b32.xlu0 %v899_v41, %s2028_s13  ;;  %v888_v44 = vpop.permute.xlu1 %887 }
 0x431   : > { %v893_v45 = vsel %vm607_vm3, %v888_v44, %v891_v43 }
 0x432   : > { %v905_v46 = vmul.f32 %v893_v45, %v530_v42 }
 0x434   : > { %v699_v47 = vpop.permute.xlu0 %698  ;;  %907 = vrot.lane.b32.xlu1 %v905_v46, %s2028_s13  ;;  %v696_v48 = vpop.permute.xlu1 %695  ;;  %s2037_s13 = smov 104  }
 0x435   : > { %v702_v49 = vsel %vm701_vm4, %v696_v48, %v699_v47 }
 0x436   : > { %v711_v50 = vmul.f32 %v702_v49, %v529_v37 }
 0x438   : > { %v707_v52 = vpop.permute.xlu0 %706  ;;  %v704_v53 = vpop.permute.xlu1 %703  ;;  %v712_v55 = vadd.f32 %v711_v50, %v710_v51 }
 0x439   : > { %v709_v54 = vsel %vm607_vm3, %v704_v53, %v707_v52 }
 0x43a   : > { %v713_v56 = vmul.f32 %v709_v54, %v530_v42 }
 0x43c   : > { %v714_v57 = vadd.f32 %v713_v56, %v712_v55  ;;  %v896_v60 = vpop.permute.xlu1 %895 }
 0x43d   : > { %v898_v62 = vmul.f32 %v896_v60, %v878_v32 }
 0x43e   : > { %v911_v58 = vpack.c.bf16 %v714_v57, %v714_v57 }
 0x440   : > { %988 = vrot.lane.b32.xlu0 %v911_v58, %s2035_s29  ;;  %v921_v59 = vsel %vm916_vm5, %v911_v58, 0  ;;  %s2363_s29 = scalar_lea.hbm %s2416_s11, %s1530_s14 }
 0x441   : > { %1604 = vmatpush3.bf16.xpose.msra.mxu0 %v921_v59 }
 0x442   : > { %1615 = vmatprep.subr.bf16.mxu0 %v2025_v0 }
 0x444   : > { %1060 = vrot.lane.b32.xlu0 %v911_v58, %s2036_s15  ;;  %s1358_s15 = scalar_lea.sflag [#allocation4], %s453_s26 }
 0x448   : > { %1132 = vrot.lane.b32.xlu0 %v911_v58, %s2037_s13  ;;  %s2042_s13 = smov [#allocation13]  }
 0x4a2   : > { %v902_v61 = vpop.permute.xlu0 %901 }
 0x4a3   : > { %v904_v63 = vadd.f32 %v902_v61, %v898_v62 }
 0x4a6   : > { %v908_v1 = vpop.permute.xlu1 %907 }
 0x4a7   : > { %v910_v2 = vadd.f32 %v908_v1, %v904_v63 }
 0x4a9   : > { %v912_v3 = vpack.c.bf16 %v910_v2, %v910_v2 }
 0x4ab   : > { %1130 = vrot.lane.b32.xlu0 %v912_v3, %s2038_s22  ;;  %914 = vrot.lane.b32.xlu1 %v912_v3, %s2027_s24  ;;  %s2041_s24 = smov 64   ;;  %s1943_s22 = sshll.u32 %s2042_s13, 4  ;;  %s1944_s22 = int_to_ptr.vmem [resolvable:$false] %s1943_s22 }
 0x4ac   : > { %p1946_p7 = scmp.lt.s32.totalorder %s2365_s30, %s1944_s22 }
 0x4af   : > { %985 = vrot.lane.b32.xlu1 %v912_v3, %s2039_s19  ;;  %s1945_s19 = scalar_lea.vmem %s1944_s22, 256 }
 0x4b0   : > { %p1947_p5 = scmp.lt.s32.totalorder %s1945_s19, %s1939_s21 }
 0x4b2   : > { %v989_v4 = vpop.permute.xlu0 %988  ;;  %p1948_p13 = por %p1947_p5, %p1946_p7 }
 0x4b3   : > { %v994_v5 = vsel %vm916_vm5, %v989_v4, 0  ;;  %1058 = vrot.lane.b32.xlu1 %v912_v3, %s2040_s5 }
 0x4b4   : > { %1610 = vmatpush3.bf16.xpose.msra.mxu1 %v994_v5  ;;  %p1949_p6 = pnand %p1948_p13, %p1942_p4 }
 0x4b5   : > { %1621 = vmatprep.subr.bf16.mxu1 %v2025_v0 }
 0x4b6   : > { %v1061_v6 = vpop.permute.xlu0 %1060 }
 0x4b7   : > { %v1066_v8 = vsel %vm916_vm5, %v1061_v6, 0 }
 0x4ba   : > { %v1133_v10 = vpop.permute.xlu0 %1132 }
 0x4bb   : > { %v1138_v12 = vsel %vm916_vm5, %v1133_v10, 0 }
 0x51d   : > { %v915_v7 = vpop.permute.xlu1 %914  ;;  %v1131_v15 = vpop.permute.xlu0 %1130 }
 0x51e   : > { %1606 = vmatmul.mubr.msk.bf16.vlgmr.msra.gmra.mxu0 %vm916_vm5, %v915_v7 }
 0x51f   : > { %1616 = vmatpush3.bf16.xpose.msra.mxu0 %v1066_v8  ;;  %1617 = vmatprep.mubr.msk.bf16.mxu0 %vm2026_vm0, %v2025_v0 }
 0x520   : > { %1627 = vmatprep.subr.mxu0 %v2025_v0 }
 0x521   : > { %v986_v11 = vpop.permute.xlu1 %985 }
 0x522   : > { %1612 = vmatmul.mubr.msk.bf16.vlgmr.msra.gmra.mxu1 %vm916_vm5, %v986_v11 }
 0x523   : > { %1622 = vmatpush3.bf16.xpose.msra.mxu1 %v1138_v12  ;;  %1623 = vmatprep.mubr.msk.bf16.mxu1 %vm2026_vm0, %v2025_v0 }
 0x524   : > { %1632 = vmatprep.subr.bf16.mxu1 %v2025_v0 }
 0x525   : > { %v1059_v13 = vpop.permute.xlu1 %1058 }
 0x526   : > { %1618 = vmatmul.mubr.msk.bf16.vlgmr.msra.gmra.mxu0 %vm916_vm5, %v1059_v13 }
 0x527   : > { %1628 = vmatpush3.msk.msra.mxu0 %vm611_vm2, %v2287_v14  ;;  %1629 = vmatprep.mubr.msk.f32.mxu0 %vm2026_vm0, %v2025_v0 }
 0x52a   : > { %1624 = vmatmul.mubr.msk.bf16.vlgmr.msra.gmra.mxu1 %vm916_vm5, %v1131_v15 }
 0x52b   : > { %1636 = vmatprep.mubr.msk.bf16.mxu1 %vm2026_vm0, %v2025_v0 }
 0x5de   : > { %v957_v16 = vpop.f32.mrf.mxu0 }
 0x5df   : > { %v963_v17 = vsel %vm916_vm5, %v957_v16, -inf }
 0x5e0   : > { %v964_v18 = vrot.slane %v963_v17, 4  ;;  %v1607_v19 = vpop.f32.mrf.mxu0 }
 0x5e2   : > { %v965_v20 = vmax.f32 %v963_v17, %v964_v18  ;;  %v960_v21 = vpop.f32.mrf.mxu0  ;;  %v1030_v22 = vpop.f32.mrf.mxu1 }
 0x5e3   : > { %v1036_v23 = vsel %vm916_vm5, %v1030_v22, -inf }
 0x5e4   : > { %v966_v14 = vrot.slane %v965_v20, 2  ;;  %v1037_v24 = vrot.slane %v1036_v23, 4  ;;  %v1608_v25 = vpop.f32.mrf.mxu0  ;;  %v1613_v26 = vpop.f32.mrf.mxu1 }
 0x5e6   : > { %v967_v27 = vmax.f32 %v965_v20, %v966_v14  ;;  %v1038_v28 = vmax.f32 %v1036_v23, %v1037_v24  ;;  %v1033_v29 = vpop.f32.mrf.mxu1  ;;  %v1102_v30 = vpop.f32.mrf.mxu0 }
 0x5e7   : > { %v1108_v31 = vsel %vm916_vm5, %v1102_v30, -inf }
 0x5e8   : > { %v968_v32 = vrot.slane %v967_v27, 1  ;;  %v1039_v33 = vrot.slane %v1038_v28, 2  ;;  %v1109_v34 = vrot.slane %v1108_v31, 4  ;;  %v1614_v35 = vpop.f32.mrf.mxu1  ;;  %v1619_v36 = vpop.f32.mrf.mxu0 }
 0x5ea   : > { %v969_v37 = vmax.f32 %v967_v27, %v968_v32  ;;  %v1040_v38 = vmax.f32 %v1038_v28, %v1039_v33  ;;  %v1110_v39 = vmax.f32 %v1108_v31, %v1109_v34  ;;  %v1105_v40 = vpop.f32.mrf.mxu0  ;;  %v1174_v41 = vpop.f32.mrf.mxu1 }
 0x5eb   : > { %v1180_v42 = vsel %vm916_vm5, %v1174_v41, -inf }
 0x5ec   : > { %v970_v43 = vsub.f32 %v957_v16, %v969_v37  ;;  %v1041_v44 = vrot.slane %v1040_v38, 1  ;;  %v1111_v45 = vrot.slane %v1110_v39, 2  ;;  %v1181_v46 = vrot.slane %v1180_v42, 4  ;;  %v1620_v47 = vpop.f32.mrf.mxu0  ;;  %v1625_v48 = vpop.f32.mrf.mxu1 }
 0x5ee   : > { %v971_v49 = vmul.f32 1.442695, %v970_v43  ;;  %v1042_v50 = vmax.f32 %v1040_v38, %v1041_v44  ;;  %v1112_v51 = vmax.f32 %v1110_v39, %v1111_v45  ;;  %v1182_v52 = vmax.f32 %v1180_v42, %v1181_v46  ;;  %v1177_v53 = vpop.f32.mrf.mxu1 }
 0x5f0   : > { %1767 = vpow2.f32 %v971_v49  ;;  %v1043_v54 = vsub.f32 %v1030_v22, %v1042_v50  ;;  %v1113_v55 = vrot.slane %v1112_v51, 1  ;;  %v1183_v56 = vrot.slane %v1182_v52, 2  ;;  %v1626_v57 = vpop.f32.mrf.mxu1 }
 0x5f1   : > { %v1762_v57 = vld [vmem:[#allocation2] sm:$0xff]  }
 0x5f2   : > { %v1044_v58 = vmul.f32 1.442695, %v1043_v54  ;;  %v1114_v59 = vmax.f32 %v1112_v51, %v1113_v55  ;;  %v1184_v60 = vmax.f32 %v1182_v52, %v1183_v56  ;;  %v1761_v56 = vld [vmem:[#allocation2 + $0x8] sm:$0xff]  }
 0x5f3   : > { %1633 = vmatpush3.bf16.msra.mxu1 %v1761_v56 }
 0x5f4   : > { %1769 = vpow2.f32 %v1044_v58  ;;  %v1115_v61 = vsub.f32 %v1102_v30, %v1114_v59  ;;  %v1185_v62 = vrot.slane %v1184_v60, 1  ;;  %1634 = vmatprep.subr.bf16.mxu1 %v2025_v0 }
 0x5f6   : > { %v1116_v63 = vmul.f32 1.442695, %v1115_v61  ;;  %v1186_v1 = vmax.f32 %v1184_v60, %v1185_v62 }
 0x5f7   : > { %1635 = vmatpush3.bf16.msra.mxu1 %v1762_v57 }
 0x5f8   : > { %1771 = vpow2.f32 %v1116_v63  ;;  %v1187_v2 = vsub.f32 %v1174_v41, %v1186_v1  ;;  %v1525_v1 = vld [vmem:[#allocation5] ss:$0 sm:$0xff] }
 0x5fa   : > { %v1188_v3 = vmul.f32 1.442695, %v1187_v2 }
 0x5fc   : > { %1773 = vpow2.f32 %v1188_v3 }
 0x5fd   : > { %v1768_v4 = vpop.eup %1767 }
 0x5fe   : > { %v973_v5 = vsel %vm916_vm5, %v1768_v4, 0.0 }
 0x5ff   : > { %v974_v6 = vrot.slane %v973_v5, 4 }
 0x601   : > { %v1770_v7 = vpop.eup %1769  ;;  %v975_v8 = vadd.f32 %v974_v6, %v973_v5 }
 0x602   : > { %v1046_v10 = vsel %vm916_vm5, %v1770_v7, 0.0 }
 0x603   : > { %v976_v11 = vrot.slane %v975_v8, 2  ;;  %v1047_v12 = vrot.slane %v1046_v10, 4 }
 0x605   : > { %v1772_v13 = vpop.eup %1771  ;;  %v1048_v15 = vadd.f32 %v1047_v12, %v1046_v10  ;;  %v977_v16 = vadd.f32 %v976_v11, %v975_v8 }
 0x606   : > { %v1118_v17 = vsel %vm916_vm5, %v1772_v13, 0.0 }
 0x607   : > { %v1049_v18 = vrot.slane %v1048_v15, 2  ;;  %v1119_v19 = vrot.slane %v1118_v17, 4  ;;  %v978_v20 = vrot.slane %v977_v16, 1 }
 0x609   : > { %v1774_v21 = vpop.eup %1773  ;;  %v1120_v22 = vadd.f32 %v1119_v19, %v1118_v17  ;;  %v979_v23 = vadd.f32 %v978_v20, %v977_v16  ;;  %v1050_v14 = vadd.f32 %v1049_v18, %v1048_v15 }
 0x60a   : > { %v1190_v24 = vsel %vm916_vm5, %v1774_v21, 0.0 }
 0x60b   : > { %v1121_v25 = vrot.slane %v1120_v22, 2  ;;  %v1191_v26 = vrot.slane %v1190_v24, 4  ;;  %1775 = vrcp.f32 %v979_v23  ;;  %v1051_v27 = vrot.slane %v1050_v14, 1 }
 0x60d   : > { %v1192_v28 = vadd.f32 %v1191_v26, %v1190_v24  ;;  %v1052_v29 = vadd.f32 %v1051_v27, %v1050_v14  ;;  %v1122_v30 = vadd.f32 %v1121_v25, %v1120_v22 }
 0x60f   : > { %v1193_v31 = vrot.slane %v1192_v28, 2  ;;  %1777 = vrcp.f32 %v1052_v29  ;;  %v1123_v32 = vrot.slane %v1122_v30, 1 }
 0x611   : > { %v1124_v33 = vadd.f32 %v1123_v32, %v1122_v30  ;;  %v1194_v34 = vadd.f32 %v1193_v31, %v1192_v28 }
 0x613   : > { %1779 = vrcp.f32 %v1124_v33  ;;  %v1195_v35 = vrot.slane %v1194_v34, 1 }
 0x615   : > { %v1196_v36 = vadd.f32 %v1195_v35, %v1194_v34 }
 0x617   : > { %1781 = vrcp.f32 %v1196_v36 }
 0x618   : > { %v1776_v37 = vpop.eup %1775 }
 0x619   : > { %v981_v38 = vmul.f32 %v1776_v37, %v1768_v4 }
 0x61b   : > { %v982_v39 = vsel %vm916_vm5, %v981_v38, 0.0 }
 0x61c   : > { %v1778_v40 = vpop.eup %1777  ;;  %983 = vadd.xlane.f32.xlu1 %v982_v39 }
 0x61d   : > { %v1054_v41 = vmul.f32 %v1778_v40, %v1770_v7 }
 0x61f   : > { %v1055_v42 = vsel %vm916_vm5, %v1054_v41, 0.0 }
 0x620   : > { %v1780_v43 = vpop.eup %1779  ;;  %1056 = vadd.xlane.f32.xlu0 %v1055_v42 }
 0x621   : > { %v1126_v44 = vmul.f32 %v1780_v43, %v1772_v13 }
 0x623   : > { %v1127_v45 = vsel %vm916_vm5, %v1126_v44, 0.0 }
 0x624   : > { %v1782_v46 = vpop.eup %1781  ;;  %1128 = vadd.xlane.f32.xlu0 %v1127_v45 }
 0x625   : > { %v1198_v47 = vmul.f32 %v1782_v46, %v1774_v21 }
 0x627   : > { %v1199_v48 = vsel %vm916_vm5, %v1198_v47, 0.0 }
 0x628   : > { %1200 = vadd.xlane.f32.xlu1 %v1199_v48 }
 0x6a5   : > { %v984_v50 = vpop.xlane.xlu1 %983 }
 0x6a9   : > { %v1057_v49 = vpop.xlane.xlu0 %1056 }
 0x6aa   : > { %v1203_v52 = vsel %vm1202_vm6, %v984_v50, %v1057_v49 }
 0x6ad   : > { %v1129_v51 = vpop.xlane.xlu0 %1128 }
 0x6ae   : > { %v1205_v53 = vsel %vm1204_vm7, %v1203_v52, %v1129_v51 }
 0x6b1   : > { %v1201_v54 = vpop.xlane.xlu1 %1200 }
 0x6b2   : > { %v1207_v55 = vsel %vm1206_vm8, %v1205_v53, %v1201_v54 }
 0x6b3   : > { %1630 = vmatmul.mubr.msk.f32.vlgmr.msra.gmra.mxu0 %vm607_vm3, %v1207_v55 }
 0x773   : > { %v1277_v58 = vpop.f32.mrf.mxu0 }
 0x774   : > { %1282 = vrot.lane.b32.xlu0 %v1277_v58, %s2041_s24 }
 0x775   : > { %v1631_v59 = vpop.f32.mrf.mxu0 }
 0x7e6   : > { %v1283_v60 = vpop.permute.xlu0 %1282 }
 0x7e7   : > { %v1285_v61 = vmul.f32 %v1283_v60, %v2279_v9 }
 0x7e9   : > { %v1286_v62 = vpack.c.bf16 %v1285_v61, %v1285_v61 }
 0x7eb   : > { %1299 = vrot.lane.b32.xlu1 %v1286_v62, %s2041_s24 }
 0x85d   : > { %v1300_v63 = vpop.permute.xlu1 %1299 }
 0x85e   : > { %1637 = vmatmul.mubr.msk.bf16.vlgmr.msra.gmra.mxu1 %vm479_vm1, %v1300_v63 }
 0x91e   : > { %v1350_v0 = vpop.f32.mrf.mxu1 }
 0x91f   : > { %v1351_v2 = vadd.f32 %v1525_v1, %v1350_v0 }
 0x920   : > { %v1638_v9 = vpop.f32.mrf.mxu1 }
 0x921   : > { %1356 = vst.msk [vmem:[%s455_s25] sm:$0xff] %vm479_vm1, %v1351_v2 }
 0x922   : > { %v1353_v3 = vpop.f32.mrf.mxu1 }
 0x923   : > { %1952 = shalt.err (!%p1949_p6)
}
 0x924   : > { %s1953_s5 = scalar_lea.hbm %s2363_s29, 128  ;;  %s1957_s16 = scalar_lea.hbm %s2416_s11, 256 }
 0x925   : > { %p1954_p10 = scmp.ne.s32.totalorder %s2363_s29, %s1953_s5  ;;  %p1958_p11 = scmp.lt.s32.totalorder %s2363_s29, %s2416_s11 }
 0x926   : > { %p1959_p0 = scmp.lt.s32.totalorder %s1957_s16, %s1953_s5 }
 0x927   : > { %p1955_p8 = pnand %p1954_p10, %p2441_p9 }
 0x928   : > { %p1960_p1 = por %p1959_p0, %p1958_p11 }
 0x929   : > { %p1956_p12 = pneg %p1955_p8 }
 0x92b   : > { %p1961_p2 = pnand %p1960_p1, %p1956_p12 }
 0x92d   : > { %1964 = shalt.err (!%p1961_p2)
}
 0x92e   : > { %1664 = dma.vmem_to_hbm [thread:$0]  (%p2441_p9), %s2365_s30, 128, %s2363_s29, %s1358_s15   ;;  %v1639_v4 = vpop.f32.mrf.mxu1 }
 0x92f PF: > { %p1701_p3 = scmp.ge.s32.totalorder %s2015_s20, 2  ;;  %s1383_s12 = sand.u32 1, %s2003_s17  }
 0x930   : > { %p2442_p4 = scmp.ne.s32.totalorder %s2426_s28, 0  ;;  %s1384_s3 = scalar_lea.sflag [#allocation4], %s1383_s12 }
 0x932   : > { %p1686_p7 = pnand %p1701_p3, %p2442_p4 }
 0x934   : > { %p1687_p5 = pneg %p1686_p7 }
 0x936   : > { %1998 = dma.done.wait (%p1687_p5), %s1384_s3, 128  }
 0x937   : > { %2000 = vsyncadd (%p1687_p5), %s1384_s3, 4294967168  ;;  %s2443_s21 = sld [smem:[#allocation19_spill]]  ;;  %p25_p13 = scmp.ge.s32.totalorder %s2128_s23, 4  }
 0x938   : > { %s2444_s19 = sld [smem:[#allocation20_spill]]  ;;  %s2445_s17 = smov %s2007_s18 }
 0x939   : > { %s2447_s20 = smov %s2128_s23  ;;  %27 = sbr.rel (!%p25_p13) target bundleno = 10 (0xa), region = 124 }
 0x93d   : > { %s2446_s18 = smov %s2443_s21 }
 0x93e   :  { %1389 = vsyncpa [#allocation3], 1 }
 0x93f   :  { %1391 = vsyncpa [#allocation3 + $0x1], 1 }
 0x940   :  { %1392 = vsyncpa [#allocation6], 1 }
 0x941   :  { %1393 = vsyncpa [#allocation9], 1 }
 0x942   :  { %1394 = vsyncpa [#allocation12], 1 }
 0x943   :  { %1395 = vsyncpa [#allocation4], 1 }
 0x944   :  { %1397 = vsyncpa [#allocation4 + $0x1], 1 }

</bundles_post_ra>
